<compile_context>
chip_gen: v7x
topology: tpu7x:2x2x1
jax: 0.10.0
libtpu: 0.0.40
codegen_flags: <defaults>
</compile_context>

<pallas_src>
import math

import numpy as np
import jax
import jax.numpy as jnp
from jax.experimental import pallas as pl
from jax.experimental.pallas import tpu as pltpu
from jax.scipy.linalg import block_diag

LOG2 = math.log(2.0)


def _ssp(x):
    # shifted softplus (torch softplus - log 2), branch-free
    return jnp.maximum(x, 0.0) + jnp.log(1.0 + jnp.exp(-jnp.abs(x))) - LOG2


def _round_up(x, m):
    return (x + m - 1) // m * m


def _cdiv(a, b):
    return -(-a // b)


def _spin_indices_np(n_elec, n_up, n_down):
    spins = (np.arange(n_elec) >= n_up).astype(np.int32)   # 0 = up, 1 = down
    spin_idx = np.zeros(n_elec, np.int32) if n_up == n_down else spins
    return spins, spin_idx


def _spec(shape, index_map, bufs=None):
    """BlockSpec with an optional explicit buffer count (graceful fallback)."""
    if bufs is not None and hasattr(pl, "Buffered"):
        try:
            return pl.BlockSpec(shape, index_map, pipeline_mode=pl.Buffered(bufs))
        except TypeError:
            pass
    return pl.BlockSpec(shape, index_map)


# ----------------------------------------------------------------------------
# Host wrapper + kernel.  One grid step == one tile of T walkers (on lanes).
# ----------------------------------------------------------------------------
def omninet_forward(rs, coords, params, *, n_up, n_down):
    B, N, _ = rs.shape
    M = coords.shape[0]
    E = params["X"].shape[-1]
    K = params["Y"].shape[-1]
    F = params["mus"].shape[-1]
    H = params["w1"].shape[-1]
    NI = params["w1"].shape[0]
    Pee, Pen = N * N, N * M

    # ---- batch tiling: walkers on the LANE axis --------------------------------
    # Prefer T=128 (lane-dense stores); for small batches keep >=2 grid steps so the
    # second v7x TensorCore gets a tile.  The extra (padded) step this forces for
    # tiny batches costs ~1 us on single-core chips.
    T = min(128, _round_up(max(_cdiv(B, 2), 1), 8))
    n_tiles = max(2, _cdiv(B, T))
    B_pad = n_tiles * T
    Lee, Len = Pee * T, Pen * T
    TN = N * T

    # ---- static pair bookkeeping ------------------------------------------------
    i_ee = np.repeat(np.arange(N), N)
    j_ee = np.tile(np.arange(N), N)
    spins, spin_idx = _spin_indices_np(N, n_up, n_down)
    same = (spins[:, None] == spins[None, :]) & (~np.eye(N, dtype=bool))
    anti = spins[:, None] != spins[None, :]
    same_p = same[i_ee, j_ee].astype(np.float32)                   # (Pee,)
    anti_p = anti[i_ee, j_ee].astype(np.float32)

    # ---- distances computed host-side (kernel streams two distance rows) --------
    rs32 = rs.astype(jnp.float32)
    rs_pad = jnp.zeros((B_pad, N, 3), jnp.float32).at[:B].set(rs32)
    co = coords.astype(jnp.float32)
    d_ee = jnp.sqrt(jnp.sum((rs_pad[:, :, None, :] - rs_pad[:, None, :, :]) ** 2, -1))
    d_en = jnp.sqrt(jnp.sum((rs_pad[:, :, None, :] - co[None, None, :, :]) ** 2, -1))
    # lane order per tile: (pair, walker) with the walker index fastest
    d_ee_t = d_ee.reshape(n_tiles, T, Pee).transpose(0, 2, 1).reshape(n_tiles, 1, Lee)
    d_en_t = d_en.reshape(n_tiles, T, Pen).transpose(0, 2, 1).reshape(n_tiles, 1, Len)

    # ---- interaction-independent elementwise modulators (masks / Y folded in) ---
    row_same = np.repeat(same_p, T)[None, :]                        # (1, Lee)
    row_anti = np.repeat(anti_p, T)[None, :]
    blk = np.concatenate([np.repeat(row_same, K, 0), np.repeat(row_anti, K, 0)], 0)
    mask_ee = jnp.asarray(np.tile(blk, (NI, 1)), jnp.float32)       # (NI*2K, Lee)

    y_it = jnp.repeat(jnp.tile(params["Y"].astype(jnp.float32), (N, 1)), T, axis=0)
    ypre = jnp.tile(y_it.T, (NI, 1))                                # (NI*K, Len)

    x0 = jnp.repeat(params["X"].astype(jnp.float32)[spin_idx], T, axis=0).T   # (E, TN)

    # ---- merged SchNet weights, transposed for the lane-major layout ------------
    w1, b1, w2, b2 = params["w1"], params["b1"], params["w2"], params["b2"]
    bf16 = jnp.bfloat16
    ee_blk = [(n, l) for n in range(NI) for l in (0, 1)]            # (same, anti) per n
    W1eT = jnp.concatenate([w1[n, l] for n, l in ee_blk], 1).T.astype(bf16)  # (NI*2H, F)
    B1eT = jnp.concatenate([b1[n, l] for n, l in ee_blk], 1).T                # (NI*2H, 1)
    W2eT = block_diag(*[w2[n, l] for n, l in ee_blk]).T.astype(bf16)          # (NI*2K, NI*2H)
    B2eT = jnp.concatenate([b2[n, l] for n, l in ee_blk], 1).T                # (NI*2K, 1)
    W1nT = jnp.concatenate([w1[n, 2] for n in range(NI)], 1).T.astype(bf16)   # (NI*H, F)
    B1nT = jnp.concatenate([b1[n, 2] for n in range(NI)], 1).T
    W2nT = block_diag(*[w2[n, 2] for n in range(NI)]).T.astype(bf16)          # (NI*K, NI*H)
    B2nT = jnp.concatenate([b2[n, 2] for n in range(NI)], 1).T
    hwT = jnp.stack([params["hw"][n].T for n in range(NI)])                    # (NI, K, E)
    hbT = jnp.stack([params["hb"][n].T for n in range(NI)])                    # (NI, K, 1)
    gT = jnp.stack([params["g"][n, l].T for n in range(NI) for l in range(3)])  # (NI*3, E, K)
    orbT = params["orb"].T                                                      # (1, E)

    # DistanceBasis buffers; -1/sigma^2 folded so the basis has one exp, no divide.
    mus_c = params["mus"].reshape(F, 1).astype(jnp.float32)
    nis2_c = (-1.0 / (params["sigmas"].astype(jnp.float32) ** 2)).reshape(F, 1)

    def kernel(d_ee_ref, d_en_ref, mus_ref, nis2_ref, x0_ref, mask_ref, ypre_ref,
               w1e_ref, b1e_ref, w2e_ref, b2e_ref,
               w1n_ref, b1n_ref, w2n_ref, b2n_ref,
               hw_ref, hb_ref, g_ref, orb_ref, out_ref):
        f32 = jnp.float32
        mus = mus_ref[...]                       # (F, 1)
        nis2 = nis2_ref[...]                     # (F, 1)

        def basis(d):                            # d: (1, L) -> (F, L); fused single exp
            return (d * d) * jnp.exp(nis2 * (d - mus) ** 2 - d)

        # ---- edge features + all (interaction, label) w-subnets, computed once ----
        e_ee = basis(d_ee_ref[0]).astype(bf16)                               # (F, Lee)
        e_en = basis(d_en_ref[0]).astype(bf16)                               # (F, Len)
        h1e = _ssp(jnp.dot(w1e_ref[...], e_ee, preferred_element_type=f32) + b1e_ref[...])
        w_ee = (jnp.dot(w2e_ref[...], h1e.astype(bf16), preferred_element_type=f32)
                + b2e_ref[...]) * mask_ref[...]                              # (NI*2K, Lee)
        h1n = _ssp(jnp.dot(w1n_ref[...], e_en, preferred_element_type=f32) + b1n_ref[...])
        w_en = (jnp.dot(w2n_ref[...], h1n.astype(bf16), preferred_element_type=f32)
                + b2n_ref[...]) * ypre_ref[...]                              # (NI*K, Len)

        # ---- SchNet interactions: lane-sliced segmented sums + tiny f32 matmuls ----
        x = x0_ref[...]                                                       # (E, N*T)
        for n in range(NI):
            h = jnp.dot(hw_ref[n], x, preferred_element_type=f32) + hb_ref[n]  # (K, N*T)
            w_s = w_ee[(2 * n) * K:(2 * n + 1) * K, :]
            w_a = w_ee[(2 * n + 1) * K:(2 * n + 2) * K, :]
            w_nu = w_en[n * K:(n + 1) * K, :]
            zs_cols, za_cols, zn_cols = [], [], []
            for i in range(N):
                zs = za = zn = None
                for j in range(N):
                    p = (i * N + j) * T
                    hj = h[:, j * T:(j + 1) * T]
                    ts = w_s[:, p:p + T] * hj
                    ta = w_a[:, p:p + T] * hj
                    zs = ts if zs is None else zs + ts
                    za = ta if za is None else za + ta
                for m in range(M):
                    q = (i * M + m) * T
                    tn_ = w_nu[:, q:q + T]
                    zn = tn_ if zn is None else zn + tn_
                zs_cols.append(zs)
                za_cols.append(za)
                zn_cols.append(zn)
            z_s = jnp.concatenate(zs_cols, axis=1)                            # (K, N*T)
            z_a = jnp.concatenate(za_cols, axis=1)
            z_n = jnp.concatenate(zn_cols, axis=1)
            x = (x
                 + jnp.dot(g_ref[3 * n + 0], z_s, preferred_element_type=f32)
                 + jnp.dot(g_ref[3 * n + 1], z_a, preferred_element_type=f32)
                 + jnp.dot(g_ref[3 * n + 2], z_n, preferred_element_type=f32))

        # ---- per-walker electron sum + orbital projection: lane-dense (1, T) out ---
        xsum = x[:, 0:T]
        for i in range(1, N):
            xsum = xsum + x[:, i * T:(i + 1) * T]                             # (E, T)
        out_ref[0] = jnp.dot(orb_ref[...], xsum, preferred_element_type=f32)  # (1, T)

    # ---- BlockSpecs --------------------------------------------------------------
    def _const(a):
        nd = a.ndim

        def imap(g):
            return (0,) * nd

        return _spec(a.shape, imap, bufs=1)       # single-buffer the grid-invariant operands

    def _stream(L):
        return _spec((1, 1, L), lambda g: (g, 0, 0))

    const_ops = (mus_c, nis2_c, x0, mask_ee, ypre,
                 W1eT, B1eT, W2eT, B2eT, W1nT, B1nT, W2nT, B2nT,
                 hwT, hbT, gT, orbT)
    in_specs = [_stream(Lee), _stream(Len)] + [_const(a) for a in const_ops]
    out_spec = pl.BlockSpec((1, 1, T), lambda g: (g, 0, 0))
    operands = (d_ee_t, d_en_t) + const_ops

    # advisory cost estimate (helps XLA schedule around the custom call)
    def _mm(m, k, n_):
        return 2 * m * k * n_

    flops_tile = (_mm(NI * 2 * H, F, Lee) + _mm(NI * 2 * K, NI * 2 * H, Lee)
                  + _mm(NI * H, F, Len) + _mm(NI * K, NI * H, Len)
                  + NI * (_mm(K, E, TN) + 3 * _mm(E, K, TN)
                          + 4 * K * (Pee + Pen) * T)
                  + _mm(1, E, T) + 12 * F * (Lee + Len))
    trans_tile = F * (Lee + Len) + 2 * (NI * 2 * H * Lee + NI * H * Len)
    const_bytes = sum(int(np.prod(a.shape)) * a.dtype.itemsize for a in const_ops)
    bytes_accessed = const_bytes + n_tiles * 4 * (Lee + Len + T)
    cost = pl.CostEstimate(flops=int(n_tiles * flops_tile),
                           transcendentals=int(n_tiles * trans_tile),
                           bytes_accessed=int(bytes_accessed))

    out = pl.pallas_call(
        kernel,
        out_shape=jax.ShapeDtypeStruct((n_tiles, 1, T), jnp.float32),
        grid=(n_tiles,),
        in_specs=in_specs,
        out_specs=out_spec,
        compiler_params=pltpu.CompilerParams(
            dimension_semantics=("parallel",),
            # total residency is <1 MiB; explicit limit keeps headroom on v7x (64 MiB/TC)
            vmem_limit_bytes=32 * 1024 * 1024),
        cost_estimate=cost,
    )(*operands)

    return out.reshape(-1)[:B], None, None


# ----------------------------------------------------------------------------
# Deterministic parameter construction (shapes implied by the module __init__).
# n_orbitals / n_backflows are accepted by the PyTorch ctor but unused here.
# ----------------------------------------------------------------------------
def init_params(key, *, n_atoms, n_up, n_down,
                dist_feat_dim=4, n_interactions=2, kernel_dim=8, embedding_dim=16):
    hidden_w = int(round((dist_feat_dim * kernel_dim) ** 0.5))   # get_log_dnn, 2 layers -> 6
    keys = iter(jax.random.split(key, 64))

    def linear(fan_in, fan_out, bias=True):
        bound = 1.0 / (fan_in ** 0.5)
        w = jax.random.uniform(next(keys), (fan_in, fan_out), jnp.float32, -bound, bound)
        b = (jax.random.uniform(next(keys), (1, fan_out), jnp.float32, -bound, bound)
             if bias else None)
        return w, b

    w1, b1, w2, b2, g = [], [], [], [], []
    for _ in range(n_interactions):
        w1n, b1n, w2n, b2n, gn = [], [], [], [], []
        for _ in range(3):                       # labels: same, anti, nuclear
            W1, B1 = linear(dist_feat_dim, hidden_w)
            W2, B2 = linear(hidden_w, kernel_dim)
            G, _ = linear(kernel_dim, embedding_dim, bias=False)
            w1n.append(W1); b1n.append(B1); w2n.append(W2); b2n.append(B2); gn.append(G)
        w1.append(jnp.stack(w1n)); b1.append(jnp.stack(b1n))
        w2.append(jnp.stack(w2n)); b2.append(jnp.stack(b2n)); g.append(jnp.stack(gn))

    hw, hb = [], []
    for _ in range(n_interactions):
        HW, HB = linear(embedding_dim, kernel_dim)
        hw.append(HW); hb.append(HB)

    n_spin_rows = 1 if n_up == n_down else 2
    X = jax.random.normal(next(keys), (n_spin_rows, embedding_dim), jnp.float32)
    Y = jax.random.normal(next(keys), (n_atoms, kernel_dim), jnp.float32)
    orb, _ = linear(embedding_dim, 1, bias=False)

    # DistanceBasis(4, cutoff=10, envelope='nocusp') buffers
    delta = 1.0 / (2 * dist_feat_dim)
    qs = jnp.linspace(delta, 1.0 - delta, dist_feat_dim)
    mus = (10.0 * qs ** 2).reshape(1, dist_feat_dim).astype(jnp.float32)
    sigmas = ((1.0 + 10.0 * qs) / 7.0).reshape(1, dist_feat_dim).astype(jnp.float32)

    return dict(
        w1=jnp.stack(w1), b1=jnp.stack(b1), w2=jnp.stack(w2), b2=jnp.stack(b2),
        g=jnp.stack(g), hw=jnp.stack(hw), hb=jnp.stack(hb),
        X=X, Y=Y, orb=orb, mus=mus, sigmas=sigmas,
    )


# ----------------------------------------------------------------------------
# Pure-JAX reference (mirrors the PyTorch forward semantics), for validation.
# ----------------------------------------------------------------------------
def omninet_reference(rs, coords, params, *, n_up, n_down):
    B, N, _ = rs.shape
    mus, sig = params["mus"][0], params["sigmas"][0]

    d_ee = jnp.sqrt(jnp.sum((rs[:, :, None, :] - rs[:, None, :, :]) ** 2, -1))
    d_en = jnp.sqrt(jnp.sum((rs[:, :, None, :] - coords[None, None, :, :]) ** 2, -1))

    def basis(d):
        env = d ** 2 * jnp.exp(-d)
        return env[..., None] * jnp.exp(-((d[..., None] - mus) ** 2) / sig ** 2)

    e_ee, e_en = basis(d_ee), basis(d_en)
    spins, spin_idx = _spin_indices_np(N, n_up, n_down)
    same = jnp.asarray((spins[:, None] == spins[None, :]) & (~np.eye(N, dtype=bool)),
                       jnp.float32)
    anti = jnp.asarray(spins[:, None] != spins[None, :], jnp.float32)
    x = jnp.broadcast_to(params["X"][spin_idx], (B, N, params["X"].shape[-1]))

    def wnet(e, n, l):
        h1 = _ssp(e @ params["w1"][n, l] + params["b1"][n, l][0])
        return h1 @ params["w2"][n, l] + params["b2"][n, l][0]

    for n in range(params["w1"].shape[0]):
        h = x @ params["hw"][n] + params["hb"][n][0]
        z_s = jnp.einsum("bijk,ij,bjk->bik", wnet(e_ee, n, 0), same, h)
        z_a = jnp.einsum("bijk,ij,bjk->bik", wnet(e_ee, n, 1), anti, h)
        z_n = jnp.einsum("bimk,mk->bik", wnet(e_en, n, 2), params["Y"])
        x = x + z_s @ params["g"][n, 0] + z_a @ params["g"][n, 1] + z_n @ params["g"][n, 2]

    return (x @ params["orb"])[..., 0].sum(-1)


if __name__ == "__main__":
    B, N_ELEC, N_ATOMS = 5, 3, 2            # rs fixture: torch.randn(5, 3, 3)
    N_UP, N_DOWN = 2, 1
    key = jax.random.PRNGKey(0)
    k_rs, k_coords, k_params = jax.random.split(key, 3)
    rs = jax.random.normal(k_rs, (B, N_ELEC, 3), jnp.float32)
    coords = 2.0 * jax.random.normal(k_coords, (N_ATOMS, 3), jnp.float32)
    params = init_params(k_params, n_atoms=N_ATOMS, n_up=N_UP, n_down=N_DOWN)

    psi, _, _ = omninet_forward(rs, coords, params, n_up=N_UP, n_down=N_DOWN)
    psi = jax.block_until_ready(psi)
    assert psi.shape == (B,), psi.shape

    ref = omninet_reference(rs, coords, params, n_up=N_UP, n_down=N_DOWN)
    err = float(jnp.max(jnp.abs(psi - ref)))
    # bf16 at the edge-MLP matmul boundaries costs a few percent relative accuracy;
    # structural bugs would show up as O(1)+ mismatches.
    tol = 5e-2 * (1.0 + float(jnp.max(jnp.abs(ref))))
    assert err < tol, f"kernel/reference mismatch: err={err}, tol={tol}"
    print("KERNEL_OK")
</pallas_src>

<mosaic_0001>
module attributes {stable_mosaic.version = 11 : i64} {
  func.func @kernel(%arg0: i32, %arg1: memref<1x1x72xf32, #tpu.memory_space<vmem>>, %arg2: memref<1x1x48xf32, #tpu.memory_space<vmem>>, %arg3: memref<4x1xf32, #tpu.memory_space<vmem>>, %arg4: memref<4x1xf32, #tpu.memory_space<vmem>>, %arg5: memref<16x24xf32, #tpu.memory_space<vmem>>, %arg6: memref<32x72xf32, #tpu.memory_space<vmem>>, %arg7: memref<16x48xf32, #tpu.memory_space<vmem>>, %arg8: memref<24x4xbf16, #tpu.memory_space<vmem>>, %arg9: memref<24x1xf32, #tpu.memory_space<vmem>>, %arg10: memref<32x24xbf16, #tpu.memory_space<vmem>>, %arg11: memref<32x1xf32, #tpu.memory_space<vmem>>, %arg12: memref<12x4xbf16, #tpu.memory_space<vmem>>, %arg13: memref<12x1xf32, #tpu.memory_space<vmem>>, %arg14: memref<16x12xbf16, #tpu.memory_space<vmem>>, %arg15: memref<16x1xf32, #tpu.memory_space<vmem>>, %arg16: memref<2x8x16xf32, #tpu.memory_space<vmem>>, %arg17: memref<2x8x1xf32, #tpu.memory_space<vmem>>, %arg18: memref<6x16x8xf32, #tpu.memory_space<vmem>>, %arg19: memref<1x16xf32, #tpu.memory_space<vmem>>, %arg20: memref<1x1x8xf32, #tpu.memory_space<vmem>>) attributes {dimension_semantics = [#tpu.dimension_semantics<parallel>], iteration_bounds = array<i64: 2>, scalar_prefetch = 0 : i64, scratch_operands = 0 : i64, tpu.core_type = #tpu.core_type<tc>, window_params = [{transform_indices = @transform_0, window_bounds = array<i64: 1, 1, 72>}, {transform_indices = @transform_1, window_bounds = array<i64: 1, 1, 48>}, {pipeline_mode = #tpu.pipeline_mode<synchronous>, transform_indices = @transform_2, window_bounds = array<i64: 4, 1>}, {pipeline_mode = #tpu.pipeline_mode<synchronous>, transform_indices = @transform_3, window_bounds = array<i64: 4, 1>}, {pipeline_mode = #tpu.pipeline_mode<synchronous>, transform_indices = @transform_4, window_bounds = array<i64: 16, 24>}, {pipeline_mode = #tpu.pipeline_mode<synchronous>, transform_indices = @transform_5, window_bounds = array<i64: 32, 72>}, {pipeline_mode = #tpu.pipeline_mode<synchronous>, transform_indices = @transform_6, window_bounds = array<i64: 16, 48>}, {pipeline_mode = #tpu.pipeline_mode<synchronous>, transform_indices = @transform_7, window_bounds = array<i64: 24, 4>}, {pipeline_mode = #tpu.pipeline_mode<synchronous>, transform_indices = @transform_8, window_bounds = array<i64: 24, 1>}, {pipeline_mode = #tpu.pipeline_mode<synchronous>, transform_indices = @transform_9, window_bounds = array<i64: 32, 24>}, {pipeline_mode = #tpu.pipeline_mode<synchronous>, transform_indices = @transform_10, window_bounds = array<i64: 32, 1>}, {pipeline_mode = #tpu.pipeline_mode<synchronous>, transform_indices = @transform_11, window_bounds = array<i64: 12, 4>}, {pipeline_mode = #tpu.pipeline_mode<synchronous>, transform_indices = @transform_12, window_bounds = array<i64: 12, 1>}, {pipeline_mode = #tpu.pipeline_mode<synchronous>, transform_indices = @transform_13, window_bounds = array<i64: 16, 12>}, {pipeline_mode = #tpu.pipeline_mode<synchronous>, transform_indices = @transform_14, window_bounds = array<i64: 16, 1>}, {pipeline_mode = #tpu.pipeline_mode<synchronous>, transform_indices = @transform_15, window_bounds = array<i64: 2, 8, 16>}, {pipeline_mode = #tpu.pipeline_mode<synchronous>, transform_indices = @transform_16, window_bounds = array<i64: 2, 8, 1>}, {pipeline_mode = #tpu.pipeline_mode<synchronous>, transform_indices = @transform_17, window_bounds = array<i64: 6, 16, 8>}, {pipeline_mode = #tpu.pipeline_mode<synchronous>, transform_indices = @transform_18, window_bounds = array<i64: 1, 16>}, {transform_indices = @transform_19, window_bounds = array<i64: 1, 1, 8>}]} {
    %c0 = arith.constant 0 : index
    %c0_0 = arith.constant 0 : index
    %0 = vector.load %arg3[%c0, %c0_0] : memref<4x1xf32, #tpu.memory_space<vmem>>, vector<4x1xf32>
    %c0_1 = arith.constant 0 : index
    %c0_2 = arith.constant 0 : index
    %1 = vector.load %arg4[%c0_1, %c0_2] : memref<4x1xf32, #tpu.memory_space<vmem>>, vector<4x1xf32>
    %c0_3 = arith.constant 0 : index
    %c0_4 = arith.constant 0 : index
    %c0_5 = arith.constant 0 : index
    %2 = vector.load %arg1[%c0_3, %c0_4, %c0_5] : memref<1x1x72xf32, #tpu.memory_space<vmem>>, vector<1x1x72xf32>
    %3 = vector.shape_cast %2 : vector<1x1x72xf32> to vector<1x72xf32>
    %4 = arith.mulf %3, %3 : vector<1x72xf32>
    %5 = vector.broadcast %3 : vector<1x72xf32> to vector<4x72xf32>
    %6 = vector.broadcast %0 : vector<4x1xf32> to vector<4x72xf32>
    %7 = arith.subf %5, %6 : vector<4x72xf32>
    %8 = arith.mulf %7, %7 : vector<4x72xf32>
    %9 = vector.broadcast %1 : vector<4x1xf32> to vector<4x72xf32>
    %10 = arith.mulf %9, %8 : vector<4x72xf32>
    %11 = vector.broadcast %3 : vector<1x72xf32> to vector<4x72xf32>
    %12 = arith.subf %10, %11 : vector<4x72xf32>
    %13 = math.exp %12 : vector<4x72xf32>
    %14 = vector.broadcast %4 : vector<1x72xf32> to vector<4x72xf32>
    %15 = arith.mulf %14, %13 : vector<4x72xf32>
    %16 = arith.truncf %15 : vector<4x72xf32> to vector<4x72xbf16>
    %c0_6 = arith.constant 0 : index
    %c0_7 = arith.constant 0 : index
    %c0_8 = arith.constant 0 : index
    %17 = vector.load %arg2[%c0_6, %c0_7, %c0_8] : memref<1x1x48xf32, #tpu.memory_space<vmem>>, vector<1x1x48xf32>
    %18 = vector.shape_cast %17 : vector<1x1x48xf32> to vector<1x48xf32>
    %19 = arith.mulf %18, %18 : vector<1x48xf32>
    %20 = vector.broadcast %18 : vector<1x48xf32> to vector<4x48xf32>
    %21 = vector.broadcast %0 : vector<4x1xf32> to vector<4x48xf32>
    %22 = arith.subf %20, %21 : vector<4x48xf32>
    %23 = arith.mulf %22, %22 : vector<4x48xf32>
    %24 = vector.broadcast %1 : vector<4x1xf32> to vector<4x48xf32>
    %25 = arith.mulf %24, %23 : vector<4x48xf32>
    %26 = vector.broadcast %18 : vector<1x48xf32> to vector<4x48xf32>
    %27 = arith.subf %25, %26 : vector<4x48xf32>
    %28 = math.exp %27 : vector<4x48xf32>
    %29 = vector.broadcast %19 : vector<1x48xf32> to vector<4x48xf32>
    %30 = arith.mulf %29, %28 : vector<4x48xf32>
    %31 = arith.truncf %30 : vector<4x48xf32> to vector<4x48xbf16>
    %c0_9 = arith.constant 0 : index
    %c0_10 = arith.constant 0 : index
    %32 = vector.load %arg8[%c0_9, %c0_10] : memref<24x4xbf16, #tpu.memory_space<vmem>>, vector<24x4xbf16>
    %cst = arith.constant dense<0.000000e+00> : vector<24x72xf32>
    %33 = tpu.matmul %32, %16, %cst {dimension_numbers = #tpu.dot_dimension_numbers<[1], [0], [0], [1], [0, 0, 1, 1], [], []>} : vector<24x4xbf16>, vector<4x72xbf16>, vector<24x72xf32> -> vector<24x72xf32>
    %c0_11 = arith.constant 0 : index
    %c0_12 = arith.constant 0 : index
    %34 = vector.load %arg9[%c0_11, %c0_12] : memref<24x1xf32, #tpu.memory_space<vmem>>, vector<24x1xf32>
    %35 = vector.broadcast %34 : vector<24x1xf32> to vector<24x72xf32>
    %36 = arith.addf %33, %35 : vector<24x72xf32>
    %cst_13 = arith.constant 0.000000e+00 : f32
    %37 = vector.broadcast %cst_13 : f32 to vector<24x72xf32>
    %38 = arith.maximumf %36, %37 : vector<24x72xf32>
    %39 = math.absf %36 : vector<24x72xf32>
    %cst_14 = arith.constant 0.000000e+00 : f32
    %40 = vector.broadcast %cst_14 : f32 to vector<24x72xf32>
    %41 = arith.subf %40, %39 : vector<24x72xf32>
    %42 = math.exp %41 : vector<24x72xf32>
    %cst_15 = arith.constant 1.000000e+00 : f32
    %43 = vector.broadcast %cst_15 : f32 to vector<24x72xf32>
    %44 = arith.addf %43, %42 : vector<24x72xf32>
    %45 = math.log %44 : vector<24x72xf32>
    %46 = arith.addf %38, %45 : vector<24x72xf32>
    %cst_16 = arith.constant 0.693147182 : f32
    %47 = vector.broadcast %cst_16 : f32 to vector<24x72xf32>
    %48 = arith.subf %46, %47 : vector<24x72xf32>
    %c0_17 = arith.constant 0 : index
    %c0_18 = arith.constant 0 : index
    %49 = vector.load %arg10[%c0_17, %c0_18] : memref<32x24xbf16, #tpu.memory_space<vmem>>, vector<32x24xbf16>
    %50 = arith.truncf %48 : vector<24x72xf32> to vector<24x72xbf16>
    %cst_19 = arith.constant dense<0.000000e+00> : vector<32x72xf32>
    %51 = tpu.matmul %49, %50, %cst_19 {dimension_numbers = #tpu.dot_dimension_numbers<[1], [0], [0], [1], [0, 0, 1, 1], [], []>} : vector<32x24xbf16>, vector<24x72xbf16>, vector<32x72xf32> -> vector<32x72xf32>
    %c0_20 = arith.constant 0 : index
    %c0_21 = arith.constant 0 : index
    %52 = vector.load %arg11[%c0_20, %c0_21] : memref<32x1xf32, #tpu.memory_space<vmem>>, vector<32x1xf32>
    %53 = vector.broadcast %52 : vector<32x1xf32> to vector<32x72xf32>
    %54 = arith.addf %51, %53 : vector<32x72xf32>
    %c0_22 = arith.constant 0 : index
    %c0_23 = arith.constant 0 : index
    %55 = vector.load %arg6[%c0_22, %c0_23] : memref<32x72xf32, #tpu.memory_space<vmem>>, vector<32x72xf32>
    %56 = arith.mulf %54, %55 : vector<32x72xf32>
    %c0_24 = arith.constant 0 : index
    %c0_25 = arith.constant 0 : index
    %57 = vector.load %arg12[%c0_24, %c0_25] : memref<12x4xbf16, #tpu.memory_space<vmem>>, vector<12x4xbf16>
    %cst_26 = arith.constant dense<0.000000e+00> : vector<12x48xf32>
    %58 = tpu.matmul %57, %31, %cst_26 {dimension_numbers = #tpu.dot_dimension_numbers<[1], [0], [0], [1], [0, 0, 1, 1], [], []>} : vector<12x4xbf16>, vector<4x48xbf16>, vector<12x48xf32> -> vector<12x48xf32>
    %c0_27 = arith.constant 0 : index
    %c0_28 = arith.constant 0 : index
    %59 = vector.load %arg13[%c0_27, %c0_28] : memref<12x1xf32, #tpu.memory_space<vmem>>, vector<12x1xf32>
    %60 = vector.broadcast %59 : vector<12x1xf32> to vector<12x48xf32>
    %61 = arith.addf %58, %60 : vector<12x48xf32>
    %cst_29 = arith.constant 0.000000e+00 : f32
    %62 = vector.broadcast %cst_29 : f32 to vector<12x48xf32>
    %63 = arith.maximumf %61, %62 : vector<12x48xf32>
    %64 = math.absf %61 : vector<12x48xf32>
    %cst_30 = arith.constant 0.000000e+00 : f32
    %65 = vector.broadcast %cst_30 : f32 to vector<12x48xf32>
    %66 = arith.subf %65, %64 : vector<12x48xf32>
    %67 = math.exp %66 : vector<12x48xf32>
    %cst_31 = arith.constant 1.000000e+00 : f32
    %68 = vector.broadcast %cst_31 : f32 to vector<12x48xf32>
    %69 = arith.addf %68, %67 : vector<12x48xf32>
    %70 = math.log %69 : vector<12x48xf32>
    %71 = arith.addf %63, %70 : vector<12x48xf32>
    %cst_32 = arith.constant 0.693147182 : f32
    %72 = vector.broadcast %cst_32 : f32 to vector<12x48xf32>
    %73 = arith.subf %71, %72 : vector<12x48xf32>
    %c0_33 = arith.constant 0 : index
    %c0_34 = arith.constant 0 : index
    %74 = vector.load %arg14[%c0_33, %c0_34] : memref<16x12xbf16, #tpu.memory_space<vmem>>, vector<16x12xbf16>
    %75 = arith.truncf %73 : vector<12x48xf32> to vector<12x48xbf16>
    %cst_35 = arith.constant dense<0.000000e+00> : vector<16x48xf32>
    %76 = tpu.matmul %74, %75, %cst_35 {dimension_numbers = #tpu.dot_dimension_numbers<[1], [0], [0], [1], [0, 0, 1, 1], [], []>} : vector<16x12xbf16>, vector<12x48xbf16>, vector<16x48xf32> -> vector<16x48xf32>
    %c0_36 = arith.constant 0 : index
    %c0_37 = arith.constant 0 : index
    %77 = vector.load %arg15[%c0_36, %c0_37] : memref<16x1xf32, #tpu.memory_space<vmem>>, vector<16x1xf32>
    %78 = vector.broadcast %77 : vector<16x1xf32> to vector<16x48xf32>
    %79 = arith.addf %76, %78 : vector<16x48xf32>
    %c0_38 = arith.constant 0 : index
    %c0_39 = arith.constant 0 : index
    %80 = vector.load %arg7[%c0_38, %c0_39] : memref<16x48xf32, #tpu.memory_space<vmem>>, vector<16x48xf32>
    %81 = arith.mulf %79, %80 : vector<16x48xf32>
    %c0_40 = arith.constant 0 : index
    %c0_41 = arith.constant 0 : index
    %82 = vector.load %arg5[%c0_40, %c0_41] : memref<16x24xf32, #tpu.memory_space<vmem>>, vector<16x24xf32>
    %c0_42 = arith.constant 0 : index
    %c0_43 = arith.constant 0 : index
    %c0_44 = arith.constant 0 : index
    %83 = vector.load %arg16[%c0_42, %c0_43, %c0_44] : memref<2x8x16xf32, #tpu.memory_space<vmem>>, vector<1x8x16xf32>
    %84 = vector.shape_cast %83 : vector<1x8x16xf32> to vector<8x16xf32>
    %cst_45 = arith.constant dense<0.000000e+00> : vector<8x24xf32>
    %85 = tpu.matmul %84, %82, %cst_45 {dimension_numbers = #tpu.dot_dimension_numbers<[1], [0], [0], [1], [0, 0, 1, 1], [], []>} : vector<8x16xf32>, vector<16x24xf32>, vector<8x24xf32> -> vector<8x24xf32>
    %c0_46 = arith.constant 0 : index
    %c0_47 = arith.constant 0 : index
    %c0_48 = arith.constant 0 : index
    %86 = vector.load %arg17[%c0_46, %c0_47, %c0_48] : memref<2x8x1xf32, #tpu.memory_space<vmem>>, vector<1x8x1xf32>
    %87 = vector.shape_cast %86 : vector<1x8x1xf32> to vector<8x1xf32>
    %88 = vector.broadcast %87 : vector<8x1xf32> to vector<8x24xf32>
    %89 = arith.addf %85, %88 : vector<8x24xf32>
    %90 = vector.extract_strided_slice %56 {offsets = [0, 0], sizes = [8, 72], strides = [1, 1]} : vector<32x72xf32> to vector<8x72xf32>
    %91 = vector.extract_strided_slice %56 {offsets = [8, 0], sizes = [8, 72], strides = [1, 1]} : vector<32x72xf32> to vector<8x72xf32>
    %92 = vector.extract_strided_slice %81 {offsets = [0, 0], sizes = [8, 48], strides = [1, 1]} : vector<16x48xf32> to vector<8x48xf32>
    %93 = vector.extract_strided_slice %89 {offsets = [0, 0], sizes = [8, 8], strides = [1, 1]} : vector<8x24xf32> to vector<8x8xf32>
    %94 = vector.extract_strided_slice %90 {offsets = [0, 0], sizes = [8, 8], strides = [1, 1]} : vector<8x72xf32> to vector<8x8xf32>
    %95 = arith.mulf %94, %93 : vector<8x8xf32>
    %96 = vector.extract_strided_slice %91 {offsets = [0, 0], sizes = [8, 8], strides = [1, 1]} : vector<8x72xf32> to vector<8x8xf32>
    %97 = arith.mulf %96, %93 : vector<8x8xf32>
    %98 = vector.extract_strided_slice %89 {offsets = [0, 8], sizes = [8, 8], strides = [1, 1]} : vector<8x24xf32> to vector<8x8xf32>
    %99 = vector.extract_strided_slice %90 {offsets = [0, 8], sizes = [8, 8], strides = [1, 1]} : vector<8x72xf32> to vector<8x8xf32>
    %100 = arith.mulf %99, %98 : vector<8x8xf32>
    %101 = vector.extract_strided_slice %91 {offsets = [0, 8], sizes = [8, 8], strides = [1, 1]} : vector<8x72xf32> to vector<8x8xf32>
    %102 = arith.mulf %101, %98 : vector<8x8xf32>
    %103 = arith.addf %95, %100 : vector<8x8xf32>
    %104 = arith.addf %97, %102 : vector<8x8xf32>
    %105 = vector.extract_strided_slice %89 {offsets = [0, 16], sizes = [8, 8], strides = [1, 1]} : vector<8x24xf32> to vector<8x8xf32>
    %106 = vector.extract_strided_slice %90 {offsets = [0, 16], sizes = [8, 8], strides = [1, 1]} : vector<8x72xf32> to vector<8x8xf32>
    %107 = arith.mulf %106, %105 : vector<8x8xf32>
    %108 = vector.extract_strided_slice %91 {offsets = [0, 16], sizes = [8, 8], strides = [1, 1]} : vector<8x72xf32> to vector<8x8xf32>
    %109 = arith.mulf %108, %105 : vector<8x8xf32>
    %110 = arith.addf %103, %107 : vector<8x8xf32>
    %111 = arith.addf %104, %109 : vector<8x8xf32>
    %112 = vector.extract_strided_slice %92 {offsets = [0, 0], sizes = [8, 8], strides = [1, 1]} : vector<8x48xf32> to vector<8x8xf32>
    %113 = vector.extract_strided_slice %92 {offsets = [0, 8], sizes = [8, 8], strides = [1, 1]} : vector<8x48xf32> to vector<8x8xf32>
    %114 = arith.addf %112, %113 : vector<8x8xf32>
    %115 = vector.extract_strided_slice %89 {offsets = [0, 0], sizes = [8, 8], strides = [1, 1]} : vector<8x24xf32> to vector<8x8xf32>
    %116 = vector.extract_strided_slice %90 {offsets = [0, 24], sizes = [8, 8], strides = [1, 1]} : vector<8x72xf32> to vector<8x8xf32>
    %117 = arith.mulf %116, %115 : vector<8x8xf32>
    %118 = vector.extract_strided_slice %91 {offsets = [0, 24], sizes = [8, 8], strides = [1, 1]} : vector<8x72xf32> to vector<8x8xf32>
    %119 = arith.mulf %118, %115 : vector<8x8xf32>
    %120 = vector.extract_strided_slice %89 {offsets = [0, 8], sizes = [8, 8], strides = [1, 1]} : vector<8x24xf32> to vector<8x8xf32>
    %121 = vector.extract_strided_slice %90 {offsets = [0, 32], sizes = [8, 8], strides = [1, 1]} : vector<8x72xf32> to vector<8x8xf32>
    %122 = arith.mulf %121, %120 : vector<8x8xf32>
    %123 = vector.extract_strided_slice %91 {offsets = [0, 32], sizes = [8, 8], strides = [1, 1]} : vector<8x72xf32> to vector<8x8xf32>
    %124 = arith.mulf %123, %120 : vector<8x8xf32>
    %125 = arith.addf %117, %122 : vector<8x8xf32>
    %126 = arith.addf %119, %124 : vector<8x8xf32>
    %127 = vector.extract_strided_slice %89 {offsets = [0, 16], sizes = [8, 8], strides = [1, 1]} : vector<8x24xf32> to vector<8x8xf32>
    %128 = vector.extract_strided_slice %90 {offsets = [0, 40], sizes = [8, 8], strides = [1, 1]} : vector<8x72xf32> to vector<8x8xf32>
    %129 = arith.mulf %128, %127 : vector<8x8xf32>
    %130 = vector.extract_strided_slice %91 {offsets = [0, 40], sizes = [8, 8], strides = [1, 1]} : vector<8x72xf32> to vector<8x8xf32>
    %131 = arith.mulf %130, %127 : vector<8x8xf32>
    %132 = arith.addf %125, %129 : vector<8x8xf32>
    %133 = arith.addf %126, %131 : vector<8x8xf32>
    %134 = vector.extract_strided_slice %92 {offsets = [0, 16], sizes = [8, 8], strides = [1, 1]} : vector<8x48xf32> to vector<8x8xf32>
    %135 = vector.extract_strided_slice %92 {offsets = [0, 24], sizes = [8, 8], strides = [1, 1]} : vector<8x48xf32> to vector<8x8xf32>
    %136 = arith.addf %134, %135 : vector<8x8xf32>
    %137 = vector.extract_strided_slice %89 {offsets = [0, 0], sizes = [8, 8], strides = [1, 1]} : vector<8x24xf32> to vector<8x8xf32>
    %138 = vector.extract_strided_slice %90 {offsets = [0, 48], sizes = [8, 8], strides = [1, 1]} : vector<8x72xf32> to vector<8x8xf32>
    %139 = arith.mulf %138, %137 : vector<8x8xf32>
    %140 = vector.extract_strided_slice %91 {offsets = [0, 48], sizes = [8, 8], strides = [1, 1]} : vector<8x72xf32> to vector<8x8xf32>
    %141 = arith.mulf %140, %137 : vector<8x8xf32>
    %142 = vector.extract_strided_slice %89 {offsets = [0, 8], sizes = [8, 8], strides = [1, 1]} : vector<8x24xf32> to vector<8x8xf32>
    %143 = vector.extract_strided_slice %90 {offsets = [0, 56], sizes = [8, 8], strides = [1, 1]} : vector<8x72xf32> to vector<8x8xf32>
    %144 = arith.mulf %143, %142 : vector<8x8xf32>
    %145 = vector.extract_strided_slice %91 {offsets = [0, 56], sizes = [8, 8], strides = [1, 1]} : vector<8x72xf32> to vector<8x8xf32>
    %146 = arith.mulf %145, %142 : vector<8x8xf32>
    %147 = arith.addf %139, %144 : vector<8x8xf32>
    %148 = arith.addf %141, %146 : vector<8x8xf32>
    %149 = vector.extract_strided_slice %89 {offsets = [0, 16], sizes = [8, 8], strides = [1, 1]} : vector<8x24xf32> to vector<8x8xf32>
    %150 = vector.extract_strided_slice %90 {offsets = [0, 64], sizes = [8, 8], strides = [1, 1]} : vector<8x72xf32> to vector<8x8xf32>
    %151 = arith.mulf %150, %149 : vector<8x8xf32>
    %152 = vector.extract_strided_slice %91 {offsets = [0, 64], sizes = [8, 8], strides = [1, 1]} : vector<8x72xf32> to vector<8x8xf32>
    %153 = arith.mulf %152, %149 : vector<8x8xf32>
    %154 = arith.addf %147, %151 : vector<8x8xf32>
    %155 = arith.addf %148, %153 : vector<8x8xf32>
    %156 = vector.extract_strided_slice %92 {offsets = [0, 32], sizes = [8, 8], strides = [1, 1]} : vector<8x48xf32> to vector<8x8xf32>
    %157 = vector.extract_strided_slice %92 {offsets = [0, 40], sizes = [8, 8], strides = [1, 1]} : vector<8x48xf32> to vector<8x8xf32>
    %158 = arith.addf %156, %157 : vector<8x8xf32>
    %159 = tpu.concatenate %110, %132, %154 in 1 : vector<8x8xf32>, vector<8x8xf32>, vector<8x8xf32> -> vector<8x24xf32>
    %160 = tpu.concatenate %111, %133, %155 in 1 : vector<8x8xf32>, vector<8x8xf32>, vector<8x8xf32> -> vector<8x24xf32>
    %161 = tpu.concatenate %114, %136, %158 in 1 : vector<8x8xf32>, vector<8x8xf32>, vector<8x8xf32> -> vector<8x24xf32>
    %c0_49 = arith.constant 0 : index
    %c0_50 = arith.constant 0 : index
    %c0_51 = arith.constant 0 : index
    %162 = vector.load %arg18[%c0_49, %c0_50, %c0_51] : memref<6x16x8xf32, #tpu.memory_space<vmem>>, vector<1x16x8xf32>
    %163 = vector.shape_cast %162 : vector<1x16x8xf32> to vector<16x8xf32>
    %cst_52 = arith.constant dense<0.000000e+00> : vector<16x24xf32>
    %164 = tpu.matmul %163, %159, %cst_52 {dimension_numbers = #tpu.dot_dimension_numbers<[1], [0], [0], [1], [0, 0, 1, 1], [], []>} : vector<16x8xf32>, vector<8x24xf32>, vector<16x24xf32> -> vector<16x24xf32>
    %165 = arith.addf %82, %164 : vector<16x24xf32>
    %c1 = arith.constant 1 : index
    %c0_53 = arith.constant 0 : index
    %c0_54 = arith.constant 0 : index
    %166 = vector.load %arg18[%c1, %c0_53, %c0_54] : memref<6x16x8xf32, #tpu.memory_space<vmem>>, vector<1x16x8xf32>
    %167 = vector.shape_cast %166 : vector<1x16x8xf32> to vector<16x8xf32>
    %cst_55 = arith.constant dense<0.000000e+00> : vector<16x24xf32>
    %168 = tpu.matmul %167, %160, %cst_55 {dimension_numbers = #tpu.dot_dimension_numbers<[1], [0], [0], [1], [0, 0, 1, 1], [], []>} : vector<16x8xf32>, vector<8x24xf32>, vector<16x24xf32> -> vector<16x24xf32>
    %169 = arith.addf %165, %168 : vector<16x24xf32>
    %c2 = arith.constant 2 : index
    %c0_56 = arith.constant 0 : index
    %c0_57 = arith.constant 0 : index
    %170 = vector.load %arg18[%c2, %c0_56, %c0_57] : memref<6x16x8xf32, #tpu.memory_space<vmem>>, vector<1x16x8xf32>
    %171 = vector.shape_cast %170 : vector<1x16x8xf32> to vector<16x8xf32>
    %cst_58 = arith.constant dense<0.000000e+00> : vector<16x24xf32>
    %172 = tpu.matmul %171, %161, %cst_58 {dimension_numbers = #tpu.dot_dimension_numbers<[1], [0], [0], [1], [0, 0, 1, 1], [], []>} : vector<16x8xf32>, vector<8x24xf32>, vector<16x24xf32> -> vector<16x24xf32>
    %173 = arith.addf %169, %172 : vector<16x24xf32>
    %c1_59 = arith.constant 1 : index
    %c0_60 = arith.constant 0 : index
    %c0_61 = arith.constant 0 : index
    %174 = vector.load %arg16[%c1_59, %c0_60, %c0_61] : memref<2x8x16xf32, #tpu.memory_space<vmem>>, vector<1x8x16xf32>
    %175 = vector.shape_cast %174 : vector<1x8x16xf32> to vector<8x16xf32>
    %cst_62 = arith.constant dense<0.000000e+00> : vector<8x24xf32>
    %176 = tpu.matmul %175, %173, %cst_62 {dimension_numbers = #tpu.dot_dimension_numbers<[1], [0], [0], [1], [0, 0, 1, 1], [], []>} : vector<8x16xf32>, vector<16x24xf32>, vector<8x24xf32> -> vector<8x24xf32>
    %c1_63 = arith.constant 1 : index
    %c0_64 = arith.constant 0 : index
    %c0_65 = arith.constant 0 : index
    %177 = vector.load %arg17[%c1_63, %c0_64, %c0_65] : memref<2x8x1xf32, #tpu.memory_space<vmem>>, vector<1x8x1xf32>
    %178 = vector.shape_cast %177 : vector<1x8x1xf32> to vector<8x1xf32>
    %179 = vector.broadcast %178 : vector<8x1xf32> to vector<8x24xf32>
    %180 = arith.addf %176, %179 : vector<8x24xf32>
    %181 = vector.extract_strided_slice %56 {offsets = [16, 0], sizes = [8, 72], strides = [1, 1]} : vector<32x72xf32> to vector<8x72xf32>
    %182 = vector.extract_strided_slice %56 {offsets = [24, 0], sizes = [8, 72], strides = [1, 1]} : vector<32x72xf32> to vector<8x72xf32>
    %183 = vector.extract_strided_slice %81 {offsets = [8, 0], sizes = [8, 48], strides = [1, 1]} : vector<16x48xf32> to vector<8x48xf32>
    %184 = vector.extract_strided_slice %180 {offsets = [0, 0], sizes = [8, 8], strides = [1, 1]} : vector<8x24xf32> to vector<8x8xf32>
    %185 = vector.extract_strided_slice %181 {offsets = [0, 0], sizes = [8, 8], strides = [1, 1]} : vector<8x72xf32> to vector<8x8xf32>
    %186 = arith.mulf %185, %184 : vector<8x8xf32>
    %187 = vector.extract_strided_slice %182 {offsets = [0, 0], sizes = [8, 8], strides = [1, 1]} : vector<8x72xf32> to vector<8x8xf32>
    %188 = arith.mulf %187, %184 : vector<8x8xf32>
    %189 = vector.extract_strided_slice %180 {offsets = [0, 8], sizes = [8, 8], strides = [1, 1]} : vector<8x24xf32> to vector<8x8xf32>
    %190 = vector.extract_strided_slice %181 {offsets = [0, 8], sizes = [8, 8], strides = [1, 1]} : vector<8x72xf32> to vector<8x8xf32>
    %191 = arith.mulf %190, %189 : vector<8x8xf32>
    %192 = vector.extract_strided_slice %182 {offsets = [0, 8], sizes = [8, 8], strides = [1, 1]} : vector<8x72xf32> to vector<8x8xf32>
    %193 = arith.mulf %192, %189 : vector<8x8xf32>
    %194 = arith.addf %186, %191 : vector<8x8xf32>
    %195 = arith.addf %188, %193 : vector<8x8xf32>
    %196 = vector.extract_strided_slice %180 {offsets = [0, 16], sizes = [8, 8], strides = [1, 1]} : vector<8x24xf32> to vector<8x8xf32>
    %197 = vector.extract_strided_slice %181 {offsets = [0, 16], sizes = [8, 8], strides = [1, 1]} : vector<8x72xf32> to vector<8x8xf32>
    %198 = arith.mulf %197, %196 : vector<8x8xf32>
    %199 = vector.extract_strided_slice %182 {offsets = [0, 16], sizes = [8, 8], strides = [1, 1]} : vector<8x72xf32> to vector<8x8xf32>
    %200 = arith.mulf %199, %196 : vector<8x8xf32>
    %201 = arith.addf %194, %198 : vector<8x8xf32>
    %202 = arith.addf %195, %200 : vector<8x8xf32>
    %203 = vector.extract_strided_slice %183 {offsets = [0, 0], sizes = [8, 8], strides = [1, 1]} : vector<8x48xf32> to vector<8x8xf32>
    %204 = vector.extract_strided_slice %183 {offsets = [0, 8], sizes = [8, 8], strides = [1, 1]} : vector<8x48xf32> to vector<8x8xf32>
    %205 = arith.addf %203, %204 : vector<8x8xf32>
    %206 = vector.extract_strided_slice %180 {offsets = [0, 0], sizes = [8, 8], strides = [1, 1]} : vector<8x24xf32> to vector<8x8xf32>
    %207 = vector.extract_strided_slice %181 {offsets = [0, 24], sizes = [8, 8], strides = [1, 1]} : vector<8x72xf32> to vector<8x8xf32>
    %208 = arith.mulf %207, %206 : vector<8x8xf32>
    %209 = vector.extract_strided_slice %182 {offsets = [0, 24], sizes = [8, 8], strides = [1, 1]} : vector<8x72xf32> to vector<8x8xf32>
    %210 = arith.mulf %209, %206 : vector<8x8xf32>
    %211 = vector.extract_strided_slice %180 {offsets = [0, 8], sizes = [8, 8], strides = [1, 1]} : vector<8x24xf32> to vector<8x8xf32>
    %212 = vector.extract_strided_slice %181 {offsets = [0, 32], sizes = [8, 8], strides = [1, 1]} : vector<8x72xf32> to vector<8x8xf32>
    %213 = arith.mulf %212, %211 : vector<8x8xf32>
    %214 = vector.extract_strided_slice %182 {offsets = [0, 32], sizes = [8, 8], strides = [1, 1]} : vector<8x72xf32> to vector<8x8xf32>
    %215 = arith.mulf %214, %211 : vector<8x8xf32>
    %216 = arith.addf %208, %213 : vector<8x8xf32>
    %217 = arith.addf %210, %215 : vector<8x8xf32>
    %218 = vector.extract_strided_slice %180 {offsets = [0, 16], sizes = [8, 8], strides = [1, 1]} : vector<8x24xf32> to vector<8x8xf32>
    %219 = vector.extract_strided_slice %181 {offsets = [0, 40], sizes = [8, 8], strides = [1, 1]} : vector<8x72xf32> to vector<8x8xf32>
    %220 = arith.mulf %219, %218 : vector<8x8xf32>
    %221 = vector.extract_strided_slice %182 {offsets = [0, 40], sizes = [8, 8], strides = [1, 1]} : vector<8x72xf32> to vector<8x8xf32>
    %222 = arith.mulf %221, %218 : vector<8x8xf32>
    %223 = arith.addf %216, %220 : vector<8x8xf32>
    %224 = arith.addf %217, %222 : vector<8x8xf32>
    %225 = vector.extract_strided_slice %183 {offsets = [0, 16], sizes = [8, 8], strides = [1, 1]} : vector<8x48xf32> to vector<8x8xf32>
    %226 = vector.extract_strided_slice %183 {offsets = [0, 24], sizes = [8, 8], strides = [1, 1]} : vector<8x48xf32> to vector<8x8xf32>
    %227 = arith.addf %225, %226 : vector<8x8xf32>
    %228 = vector.extract_strided_slice %180 {offsets = [0, 0], sizes = [8, 8], strides = [1, 1]} : vector<8x24xf32> to vector<8x8xf32>
    %229 = vector.extract_strided_slice %181 {offsets = [0, 48], sizes = [8, 8], strides = [1, 1]} : vector<8x72xf32> to vector<8x8xf32>
    %230 = arith.mulf %229, %228 : vector<8x8xf32>
    %231 = vector.extract_strided_slice %182 {offsets = [0, 48], sizes = [8, 8], strides = [1, 1]} : vector<8x72xf32> to vector<8x8xf32>
    %232 = arith.mulf %231, %228 : vector<8x8xf32>
    %233 = vector.extract_strided_slice %180 {offsets = [0, 8], sizes = [8, 8], strides = [1, 1]} : vector<8x24xf32> to vector<8x8xf32>
    %234 = vector.extract_strided_slice %181 {offsets = [0, 56], sizes = [8, 8], strides = [1, 1]} : vector<8x72xf32> to vector<8x8xf32>
    %235 = arith.mulf %234, %233 : vector<8x8xf32>
    %236 = vector.extract_strided_slice %182 {offsets = [0, 56], sizes = [8, 8], strides = [1, 1]} : vector<8x72xf32> to vector<8x8xf32>
    %237 = arith.mulf %236, %233 : vector<8x8xf32>
    %238 = arith.addf %230, %235 : vector<8x8xf32>
    %239 = arith.addf %232, %237 : vector<8x8xf32>
    %240 = vector.extract_strided_slice %180 {offsets = [0, 16], sizes = [8, 8], strides = [1, 1]} : vector<8x24xf32> to vector<8x8xf32>
    %241 = vector.extract_strided_slice %181 {offsets = [0, 64], sizes = [8, 8], strides = [1, 1]} : vector<8x72xf32> to vector<8x8xf32>
    %242 = arith.mulf %241, %240 : vector<8x8xf32>
    %243 = vector.extract_strided_slice %182 {offsets = [0, 64], sizes = [8, 8], strides = [1, 1]} : vector<8x72xf32> to vector<8x8xf32>
    %244 = arith.mulf %243, %240 : vector<8x8xf32>
    %245 = arith.addf %238, %242 : vector<8x8xf32>
    %246 = arith.addf %239, %244 : vector<8x8xf32>
    %247 = vector.extract_strided_slice %183 {offsets = [0, 32], sizes = [8, 8], strides = [1, 1]} : vector<8x48xf32> to vector<8x8xf32>
    %248 = vector.extract_strided_slice %183 {offsets = [0, 40], sizes = [8, 8], strides = [1, 1]} : vector<8x48xf32> to vector<8x8xf32>
    %249 = arith.addf %247, %248 : vector<8x8xf32>
    %250 = tpu.concatenate %201, %223, %245 in 1 : vector<8x8xf32>, vector<8x8xf32>, vector<8x8xf32> -> vector<8x24xf32>
    %251 = tpu.concatenate %202, %224, %246 in 1 : vector<8x8xf32>, vector<8x8xf32>, vector<8x8xf32> -> vector<8x24xf32>
    %252 = tpu.concatenate %205, %227, %249 in 1 : vector<8x8xf32>, vector<8x8xf32>, vector<8x8xf32> -> vector<8x24xf32>
    %c3 = arith.constant 3 : index
    %c0_66 = arith.constant 0 : index
    %c0_67 = arith.constant 0 : index
    %253 = vector.load %arg18[%c3, %c0_66, %c0_67] : memref<6x16x8xf32, #tpu.memory_space<vmem>>, vector<1x16x8xf32>
    %254 = vector.shape_cast %253 : vector<1x16x8xf32> to vector<16x8xf32>
    %cst_68 = arith.constant dense<0.000000e+00> : vector<16x24xf32>
    %255 = tpu.matmul %254, %250, %cst_68 {dimension_numbers = #tpu.dot_dimension_numbers<[1], [0], [0], [1], [0, 0, 1, 1], [], []>} : vector<16x8xf32>, vector<8x24xf32>, vector<16x24xf32> -> vector<16x24xf32>
    %256 = arith.addf %173, %255 : vector<16x24xf32>
    %c4 = arith.constant 4 : index
    %c0_69 = arith.constant 0 : index
    %c0_70 = arith.constant 0 : index
    %257 = vector.load %arg18[%c4, %c0_69, %c0_70] : memref<6x16x8xf32, #tpu.memory_space<vmem>>, vector<1x16x8xf32>
    %258 = vector.shape_cast %257 : vector<1x16x8xf32> to vector<16x8xf32>
    %cst_71 = arith.constant dense<0.000000e+00> : vector<16x24xf32>
    %259 = tpu.matmul %258, %251, %cst_71 {dimension_numbers = #tpu.dot_dimension_numbers<[1], [0], [0], [1], [0, 0, 1, 1], [], []>} : vector<16x8xf32>, vector<8x24xf32>, vector<16x24xf32> -> vector<16x24xf32>
    %260 = arith.addf %256, %259 : vector<16x24xf32>
    %c5 = arith.constant 5 : index
    %c0_72 = arith.constant 0 : index
    %c0_73 = arith.constant 0 : index
    %261 = vector.load %arg18[%c5, %c0_72, %c0_73] : memref<6x16x8xf32, #tpu.memory_space<vmem>>, vector<1x16x8xf32>
    %262 = vector.shape_cast %261 : vector<1x16x8xf32> to vector<16x8xf32>
    %cst_74 = arith.constant dense<0.000000e+00> : vector<16x24xf32>
    %263 = tpu.matmul %262, %252, %cst_74 {dimension_numbers = #tpu.dot_dimension_numbers<[1], [0], [0], [1], [0, 0, 1, 1], [], []>} : vector<16x8xf32>, vector<8x24xf32>, vector<16x24xf32> -> vector<16x24xf32>
    %264 = arith.addf %260, %263 : vector<16x24xf32>
    %265 = vector.extract_strided_slice %264 {offsets = [0, 0], sizes = [16, 8], strides = [1, 1]} : vector<16x24xf32> to vector<16x8xf32>
    %266 = vector.extract_strided_slice %264 {offsets = [0, 8], sizes = [16, 8], strides = [1, 1]} : vector<16x24xf32> to vector<16x8xf32>
    %267 = arith.addf %265, %266 : vector<16x8xf32>
    %268 = vector.extract_strided_slice %264 {offsets = [0, 16], sizes = [16, 8], strides = [1, 1]} : vector<16x24xf32> to vector<16x8xf32>
    %269 = arith.addf %267, %268 : vector<16x8xf32>
    %c0_75 = arith.constant 0 : index
    %c0_76 = arith.constant 0 : index
    %270 = vector.load %arg19[%c0_75, %c0_76] : memref<1x16xf32, #tpu.memory_space<vmem>>, vector<1x16xf32>
    %cst_77 = arith.constant dense<0.000000e+00> : vector<1x8xf32>
    %271 = tpu.matmul %270, %269, %cst_77 {dimension_numbers = #tpu.dot_dimension_numbers<[1], [0], [0], [1], [0, 0, 1, 1], [], []>} : vector<1x16xf32>, vector<16x8xf32>, vector<1x8xf32> -> vector<1x8xf32>
    %c0_78 = arith.constant 0 : index
    %c0_79 = arith.constant 0 : index
    %c0_80 = arith.constant 0 : index
    %272 = vector.load %arg20[%c0_78, %c0_79, %c0_80] : memref<1x1x8xf32, #tpu.memory_space<vmem>>, vector<1x1x8xf32>
    %273 = vector.shape_cast %272 : vector<1x1x8xf32> to vector<1x8xf32>
    %274 = vector.shape_cast %271 : vector<1x8xf32> to vector<1x1x8xf32>
    tpu.vector_store %arg20[%c0_78, %c0_79, %c0_80], %274 {strides = array<i32>} : memref<1x1x8xf32, #tpu.memory_space<vmem>>, vector<1x1x8xf32>,
    return
  }
  func.func @transform_0(%arg0: i32) -> (i32, i32, i32) {
    %c0_i32 = arith.constant 0 : i32
    %c0_i32_0 = arith.constant 0 : i32
    %c0_i32_1 = arith.constant 0 : i32
    return %arg0, %c0_i32, %c0_i32_0 : i32, i32, i32
  }
  func.func @transform_1(%arg0: i32) -> (i32, i32, i32) {
    %c0_i32 = arith.constant 0 : i32
    %c0_i32_0 = arith.constant 0 : i32
    %c0_i32_1 = arith.constant 0 : i32
    return %arg0, %c0_i32, %c0_i32_0 : i32, i32, i32
  }
  func.func @transform_2(%arg0: i32) -> (i32, i32) {
    %c0_i32 = arith.constant 0 : i32
    %c0_i32_0 = arith.constant 0 : i32
    %c0_i32_1 = arith.constant 0 : i32
    return %c0_i32, %c0_i32_0 : i32, i32
  }
  func.func @transform_3(%arg0: i32) -> (i32, i32) {
    %c0_i32 = arith.constant 0 : i32
    %c0_i32_0 = arith.constant 0 : i32
    %c0_i32_1 = arith.constant 0 : i32
    return %c0_i32, %c0_i32_0 : i32, i32
  }
  func.func @transform_4(%arg0: i32) -> (i32, i32) {
    %c0_i32 = arith.constant 0 : i32
    %c0_i32_0 = arith.constant 0 : i32
    %c0_i32_1 = arith.constant 0 : i32
    return %c0_i32, %c0_i32_0 : i32, i32
  }
  func.func @transform_5(%arg0: i32) -> (i32, i32) {
    %c0_i32 = arith.constant 0 : i32
    %c0_i32_0 = arith.constant 0 : i32
    %c0_i32_1 = arith.constant 0 : i32
    return %c0_i32, %c0_i32_0 : i32, i32
  }
  func.func @transform_6(%arg0: i32) -> (i32, i32) {
    %c0_i32 = arith.constant 0 : i32
    %c0_i32_0 = arith.constant 0 : i32
    %c0_i32_1 = arith.constant 0 : i32
    return %c0_i32, %c0_i32_0 : i32, i32
  }
  func.func @transform_7(%arg0: i32) -> (i32, i32) {
    %c0_i32 = arith.constant 0 : i32
    %c0_i32_0 = arith.constant 0 : i32
    %c0_i32_1 = arith.constant 0 : i32
    return %c0_i32, %c0_i32_0 : i32, i32
  }
  func.func @transform_8(%arg0: i32) -> (i32, i32) {
    %c0_i32 = arith.constant 0 : i32
    %c0_i32_0 = arith.constant 0 : i32
    %c0_i32_1 = arith.constant 0 : i32
    return %c0_i32, %c0_i32_0 : i32, i32
  }
  func.func @transform_9(%arg0: i32) -> (i32, i32) {
    %c0_i32 = arith.constant 0 : i32
    %c0_i32_0 = arith.constant 0 : i32
    %c0_i32_1 = arith.constant 0 : i32
    return %c0_i32, %c0_i32_0 : i32, i32
  }
  func.func @transform_10(%arg0: i32) -> (i32, i32) {
    %c0_i32 = arith.constant 0 : i32
    %c0_i32_0 = arith.constant 0 : i32
    %c0_i32_1 = arith.constant 0 : i32
    return %c0_i32, %c0_i32_0 : i32, i32
  }
  func.func @transform_11(%arg0: i32) -> (i32, i32) {
    %c0_i32 = arith.constant 0 : i32
    %c0_i32_0 = arith.constant 0 : i32
    %c0_i32_1 = arith.constant 0 : i32
    return %c0_i32, %c0_i32_0 : i32, i32
  }
  func.func @transform_12(%arg0: i32) -> (i32, i32) {
    %c0_i32 = arith.constant 0 : i32
    %c0_i32_0 = arith.constant 0 : i32
    %c0_i32_1 = arith.constant 0 : i32
    return %c0_i32, %c0_i32_0 : i32, i32
  }
  func.func @transform_13(%arg0: i32) -> (i32, i32) {
    %c0_i32 = arith.constant 0 : i32
    %c0_i32_0 = arith.constant 0 : i32
    %c0_i32_1 = arith.constant 0 : i32
    return %c0_i32, %c0_i32_0 : i32, i32
  }
  func.func @transform_14(%arg0: i32) -> (i32, i32) {
    %c0_i32 = arith.constant 0 : i32
    %c0_i32_0 = arith.constant 0 : i32
    %c0_i32_1 = arith.constant 0 : i32
    return %c0_i32, %c0_i32_0 : i32, i32
  }
  func.func @transform_15(%arg0: i32) -> (i32, i32, i32) {
    %c0_i32 = arith.constant 0 : i32
    %c0_i32_0 = arith.constant 0 : i32
    %c0_i32_1 = arith.constant 0 : i32
    %c0_i32_2 = arith.constant 0 : i32
    return %c0_i32, %c0_i32_0, %c0_i32_1 : i32, i32, i32
  }
  func.func @transform_16(%arg0: i32) -> (i32, i32, i32) {
    %c0_i32 = arith.constant 0 : i32
    %c0_i32_0 = arith.constant 0 : i32
    %c0_i32_1 = arith.constant 0 : i32
    %c0_i32_2 = arith.constant 0 : i32
    return %c0_i32, %c0_i32_0, %c0_i32_1 : i32, i32, i32
  }
  func.func @transform_17(%arg0: i32) -> (i32, i32, i32) {
    %c0_i32 = arith.constant 0 : i32
    %c0_i32_0 = arith.constant 0 : i32
    %c0_i32_1 = arith.constant 0 : i32
    %c0_i32_2 = arith.constant 0 : i32
    return %c0_i32, %c0_i32_0, %c0_i32_1 : i32, i32, i32
  }
  func.func @transform_18(%arg0: i32) -> (i32, i32) {
    %c0_i32 = arith.constant 0 : i32
    %c0_i32_0 = arith.constant 0 : i32
    %c0_i32_1 = arith.constant 0 : i32
    return %c0_i32, %c0_i32_0 : i32, i32
  }
  func.func @transform_19(%arg0: i32) -> (i32, i32, i32) {
    %c0_i32 = arith.constant 0 : i32
    %c0_i32_0 = arith.constant 0 : i32
    %c0_i32_1 = arith.constant 0 : i32
    return %arg0, %c0_i32, %c0_i32_0 : i32, i32, i32
  }
}

</mosaic_0001>

<bundles_post_ra>
// kernel: tpu_custom_call.1
= control target key start
LH: loop header
LB: loop body
LE: loop exit
PB: predicated region body
PF: predicated region fallthrough
CT: control target
= control target key end

     0   :  { %s2921_s0 = inlined_call_operand.vmem [shape: f32[2,1,72], index: 0, kind: input, shape index: {}]   ;;  %s2922_s1 = inlined_call_operand.vmem [shape: f32[2,1,48], index: 1, kind: input, shape index: {}]   ;;  %s2923_s2 = inlined_call_operand.vmem [shape: f32[4,1], index: 2, kind: input, shape index: {}]   ;;  %s2924_s3 = inlined_call_operand.vmem [shape: f32[4,1], index: 3, kind: input, shape index: {}]   ;;  %s2925_s4 = inlined_call_operand.vmem [shape: f32[16,24], index: 4, kind: input, shape index: {}]   ;;  %s2926_s5 = inlined_call_operand.vmem [shape: f32[32,72], index: 5, kind: input, shape index: {}]   ;;  %s2927_s6 = inlined_call_operand.vmem [shape: f32[16,48], index: 6, kind: input, shape index: {}]   ;;  %s2928_s7 = inlined_call_operand.vmem [shape: bf16[24,4], index: 7, kind: input, shape index: {}]   ;;  %s2929_s8 = inlined_call_operand.vmem [shape: f32[24,1], index: 8, kind: input, shape index: {}]   ;;  %s2930_s9 = inlined_call_operand.vmem [shape: bf16[32,24], index: 9, kind: input, shape index: {}]   ;;  %s2931_s10 = inlined_call_operand.vmem [shape: f32[32,1], index: 10, kind: input, shape index: {}]   ;;  %s2932_s11 = inlined_call_operand.vmem [shape: bf16[12,4], index: 11, kind: input, shape index: {}]   ;;  %s2933_s12 = inlined_call_operand.vmem [shape: f32[12,1], index: 12, kind: input, shape index: {}]   ;;  %s2934_s13 = inlined_call_operand.vmem [shape: bf16[16,12], index: 13, kind: input, shape index: {}]   ;;  %s2935_s14 = inlined_call_operand.vmem [shape: f32[16,1], index: 14, kind: input, shape index: {}]   ;;  %s2936_s15 = inlined_call_operand.vmem [shape: f32[2,8,16], index: 15, kind: input, shape index: {}]   ;;  %s2937_s16 = inlined_call_operand.vmem [shape: f32[2,8,1], index: 16, kind: input, shape index: {}]   ;;  %s2938_s17 = inlined_call_operand.vmem [shape: f32[6,16,8], index: 17, kind: input, shape index: {}]   ;;  %s2939_s18 = inlined_call_operand.vmem [shape: f32[1,16], index: 18, kind: input, shape index: {}]   ;;  %s2940_s19 = inlined_call_operand.hbm [shape: f32[2,1,8], index: 19, kind: output, shape index: {}]  }
   0x1   :  { %2946 = sst [smem:[#allocation10_spill]] %s2921_s0 }
   0x2   :  { %2947 = sst [smem:[#allocation11_spill]] %s2922_s1 }
   0x3   :  { %2948 = sst [smem:[#allocation12_spill]] %s2923_s2 }
   0x4   :  { %2949 = sst [smem:[#allocation13_spill]] %s2924_s3 }
   0x5   :  { %2950 = sst [smem:[#allocation14_spill]] %s2929_s8 }
   0x6   :  { %2951 = sst [smem:[#allocation15_spill]] %s2933_s12 }
   0x7   :  { %24 = vsyncpa [#allocation3], 0 }
   0x8   :  { %26 = vsyncpa [#allocation3 + $0x1], 0  ;;  %s2544_s0 = smov 0   ;;  %s2546_s30 = smov 0  }
   0x9   :  { %s2548_s20 = smov 0   ;;  %s2550_s21 = smov 0  }
   0xa LB: > { %2952 = sst [smem:[#allocation5_spill]] %s2420_s0  ;;  %s2565_s1 = sadd.s32 4294967295, %s2432_s21   ;;  %s2432_s21 = sphi %s2550_s21, %s2967_s21   ;;  %s2428_s20 = sphi %s2548_s20, %s2972_s20   ;;  %s2424_s30 = sphi %s2546_s30, %s2971_s30   ;;  %s2420_s0 = sphi %s2544_s0, %s2970_s0  }
   0xb   : > { %2953 = sst [smem:[#allocation6_spill]] %s2428_s20  ;;  %s2101_s22 = sadd.s32 4294967294, %s2432_s21  }
   0xc   : > { %s2569_s2 = sadd.s32 1, %s2432_s21   ;;  %s448_s23 = sadd.s32 1, %s2428_s20 }
   0xd   : > { %2954 = sst [smem:[#allocation7_spill]] %s2569_s2  ;;  %s445_s24 = ssub.s32 %s2432_s21, %s2569_s2 }
   0xe   : > { %p458_p0 = scmp.ne.s32.totalorder %s2428_s20, %s2424_s30  ;;  %p446_p1 = scmp.eq.s32.totalorder %s445_s24, 0 }
   0xf   : > { %p459_p2 = scmp.eq.s32.totalorder %s2565_s1, 1  ;;  %p464_p3 = scmp.ne.s32.totalorder %s2424_s30, %s2420_s0 }
  0x10   : > { %p465_p4 = scmp.eq.s32.totalorder %s2101_s22, 1  ;;  %p2104_p7 = scmp.ge.s32.totalorder %s2432_s21, 1 }
  0x11   : > { %s2580_s25 = scalar_select %p446_p1, %s2428_s20, %s448_s23  }
  0x12   : > { %p2582_p5 = por %p459_p2, %p458_p0  ;;  %p2586_p6 = por %p465_p4, %p464_p3 }
  0x13   : > { %2955 = sst [smem:[#allocation8_spill]] %s2580_s25  ;;  %p546_p8 = scmp.lt.s32.totalorder %s2432_s21, 3 }
  0x14   : > { %s2957_s26 = scalar_select %p2586_p6, 1, 0 }
  0x15   : > { %p547_p9 = pnand %p2104_p7, %p546_p8 }
  0x16   : > { %2958 = sst [smem:[#allocation9_spill]] %s2957_s26  ;;  %v2434_v1 = vmov (!%p547_p9), 0   ;;  %s2960_s24 = sld [smem:[#allocation13_spill]] (!%p547_p9)  ;;  %v789_v5 = vld [vmem:[%s2931_s10] sm:$0xff] (!%p547_p9)  ;;  %vm694_vm0 = vcmask (!%p547_p9), 31744   ;;  %v790_v11 = vld [vmem:[%s2931_s10 + $0x8] sm:$0xff] (!%p547_p9)  ;;  %v614_v12 = vlaneseq (!%p547_p9) }
  0x17   : > { %550 = sbr.rel (%p547_p9) target bundleno = 2299 (0x8fb), region = 96  ;;  %s2959_s29 = sld [smem:[#allocation12_spill]] (!%p547_p9)  ;;  %2338 = vset.pattern.permute.xlu0 (!%p547_p9), %v2434_v1  ;;  %2339 = vset.pattern.permute.xlu1 (!%p547_p9), %v2434_v1  ;;  %v2340_v6 = vld [vmem:[%s2928_s7] sm:$0xff] (!%p547_p9)   ;;  %vm701_vm1 = vcmask (!%p547_p9), 1041408   ;;  %v2341_v41 = vld [vmem:[%s2928_s7 + $0x8] ss:$0 sps:$4 sm:$0xff] (!%p547_p9)  }
  0x18   : > { %s2961_s8 = sld [smem:[#allocation14_spill]] (!%p547_p9)  ;;  %s2962_s12 = sld [smem:[#allocation15_spill]] (!%p547_p9)  ;;  %2192 = vmatprep.mubr.msk.bf16.mxu0 (!%p547_p9), %vm694_vm0, %v2340_v6  ;;  %v1053_v10 = vld [vmem:[%s2937_s16] sm:$0xff] (!%p547_p9)  ;;  %v615_v13 = vshrl.u32 (!%p547_p9), %v614_v12, 7  ;;  %v2435_v43 = vmov (!%p547_p9), 0.0   ;;  %vm2436_vm2 = vmmov (!%p547_p9), 0  }
  0x19   : > { %p602_p10 = scmp.lt.s32.totalorder (!%p547_p9), %s2565_s1, 1  ;;  %s2963_s26 = sld [smem:[#allocation10_spill]] (!%p547_p9)  ;;  %v2437_v45 = vmov (!%p547_p9), 0.0|0.0   ;;  %v2645_v46 = vld [vmem:[%s2925_s4] sm:$0xff] (!%p547_p9)  ;;  %v2650_v47 = vld [vmem:[%s2925_s4 + $0x8] sm:$0xff] (!%p547_p9)  ;;  %vm1059_vm3 = vcmask (!%p547_p9), 130048  }
  0x1a   : > { %v616_v14 = vsub.s32 (!%p547_p9), 0, %v615_v13  ;;  %v2342_v48 = vld [vmem:[%s2932_s11] sm:$0x3f] (!%p547_p9)   ;;  %v2268_v49 = vpack.c.bf16 (!%p547_p9), %v2650_v47, %v2645_v46  ;;  %vm823_vm4 = vcmask (!%p547_p9), 195584   ;;  %vm830_vm5 = vcmask (!%p547_p9), 1043456   ;;  %s2442_s22 = smov (!%p547_p9), 96  }
  0x1b   : > { %v1052_v50 = vld [vmem:[%s2936_s15] sm:$0xff] (!%p547_p9)  ;;  %vm1001_vm6 = vcmask (!%p547_p9), 1045504   ;;  %vm997_vm7 = vcmask (!%p547_p9), 97280   ;;  %vm1213_vm8 = vcmask (!%p547_p9), 64512   ;;  %vm2025_vm9 = vcmask (!%p547_p9), 57344  }
  0x1c   : > { %v610_v2 = vld [vmem:[%s2960_s24] sm:$0xf] (!%p547_p9)  ;;  %s2438_s24 = smov (!%p547_p9), 48  }
  0x1d   : > { %v609_v0 = vld [vmem:[%s2959_s29] sm:$0xf] (!%p547_p9) }
  0x1e   : > { %621 = vperm.xlu0 %2338, %v609_v0   ;;  %v670_v3 = vld [vmem:[%s2961_s8 + $0x10] sm:$0xff]  ;;  %v894_v4 = vld [vmem:[%s2962_s12 + $0x8] sm:$0xf]  ;;  %v668_v7 = vld [vmem:[%s2961_s8] sm:$0xff]  ;;  %s603_s20 = scalar_select %p602_p10, %s2565_s1, 1 }
  0x1f   : > { %673 = vperm.xlu1 %2339, %v668_v7   ;;  %v669_v8 = vld [vmem:[%s2961_s8 + $0x8] sm:$0xff]  ;;  %v893_v9 = vld [vmem:[%s2962_s12] sm:$0xff]  ;;  %s2964_s12 = sld [smem:[#allocation11_spill]]  ;;  %s2439_s8 = smov 24  }
  0x20   : > { %s604_s23 = scalar_lea.vmem %s2963_s26, %s603_s20  ;;  %v2343_v51 = vld [vmem:[%s2930_s9] sm:$0xff]  }
  0x21   : > { %v611_v15 = vld [vmem:[%s604_s23] sm:$0x1]  ;;  %2200 = vmatprep.mubr.msk.bf16.mxu1 %vm823_vm4, %v2343_v51  ;;  %s2440_s23 = smov 120  }
  0x22   : > { %628 = vperm.xlu0 %2338, %v610_v2   ;;  %v617_v17 = vrot.slane %v611_v15, %v616_v14  ;;  %v612_v31 = vmul.f32 %v611_v15, %v611_v15 }
  0x23   : > { %678 = vperm.xlu1 %2339, %v669_v8  }
  0x24   : > { %v639_v33 = vrot.slane %v612_v31, %v616_v14 }
  0x25   : > { %s607_s0 = scalar_lea.vmem %s2964_s12, %s603_s20  ;;  %s2441_s12 = smov 112  }
  0x26   : > { %683 = vperm.xlu0 %2338, %v670_v3   ;;  %v643_v16 = vld [vmem:[%s607_s0] sm:$0x1] }
  0x27   : > { %897 = vperm.xlu1 %2339, %v893_v9   ;;  %v649_v18 = vrot.slane %v643_v16, %v616_v14  ;;  %v644_v32 = vmul.f32 %v643_v16, %v643_v16 }
  0x29   : > { %v661_v34 = vrot.slane %v644_v32, %v616_v14 }
  0x2a   : > { %902 = vperm.xlu0 %2338, %v894_v4  }
  0x2b   : > { %1056 = vperm.xlu1 %2339, %v1053_v10  }
  0x2e   : > { %795 = vperm.xlu0 %2338, %v789_v5  }
  0x2f   : > { %800 = vperm.xlu1 %2339, %v790_v11  }
  0x9d   : > { %v622_v19 = vpop.permute.xlu0 %621 }
  0x9e   : > { %v624_v20 = vsub.f32 %v617_v17, %v622_v19  ;;  %v651_v21 = vsub.f32 %v649_v18, %v622_v19  ;;  %v674_v52 = vpop.permute.xlu1 %673 }
  0xa0   : > { %v625_v22 = vmul.f32 %v624_v20, %v624_v20  ;;  %v652_v23 = vmul.f32 %v651_v21, %v651_v21 }
  0xa1   : > { %v629_v24 = vpop.permute.xlu0 %628 }
  0xa2   : > { %v631_v25 = vmul.f32 %v629_v24, %v625_v22  ;;  %v653_v26 = vmul.f32 %v652_v23, %v629_v24  ;;  %v679_v57 = vpop.permute.xlu1 %678 }
  0xa4   : > { %v632_v27 = vsub.f32 %v631_v25, %v617_v17  ;;  %v654_v28 = vsub.f32 %v653_v26, %v649_v18 }
  0xa5   : > { %v684_v53 = vpop.permute.xlu0 %683 }
  0xa6   : > { %v633_v29 = vmul.f32 1.442695, %v632_v27  ;;  %v655_v30 = vmul.f32 1.442695, %v654_v28  ;;  %v898_v4 = vpop.permute.xlu1 %897  ;;  %v980_v28 = vld [vmem:[%s2935_s14] sm:$0xff] }
  0xa8   : > { %2346 = vpow2.f32 %v633_v29 }
  0xa9   : > { %2348 = vpow2.f32 %v655_v30  ;;  %v903_v10 = vpop.permute.xlu0 %902 }
  0xaa   : > { %v1057_v20 = vpop.permute.xlu1 %1056 }
  0xb2   : > { %v2347_v35 = vpop.eup %2346 }
  0xb3   : > { %v2349_v36 = vpop.eup %2348  ;;  %v641_v37 = vmul.f32 %v2347_v35, %v639_v33 }
  0xb4   : > { %v663_v38 = vmul.f32 %v2349_v36, %v661_v34 }
  0xb5   : > { %v642_v39 = vpack.c.bf16 %v641_v37, %v641_v37 }
  0xb6   : > { %v664_v42 = vpack.c.bf16 %v663_v38, %v663_v38 }
  0xb7   : > { %2288 = vmatprep.subr.msk.bf16.mxu0 %vm701_vm1, %v642_v39  ;;  %v703_v40 = vsel %vm701_vm1, %v642_v39, 0 }
  0xb8   : > { %2191 = vmatpush3.bf16.msra.mxu0 %v703_v40  ;;  %v914_v44 = vsel %vm701_vm1, %v664_v42, 0 }
  0xb9   : > { %2204 = vmatprep.subr.bf16.mxu0 %v2435_v43 }
  0xbb   : > { %2193 = vmatmul.mubr.msk.bf16.vlgmr.msra.gmra.mrb[0].mxu0 %vm694_vm0, %v2341_v41 }
  0xbc   : > { %2205 = vmatpush3.bf16.msra.mxu0 %v914_v44  ;;  %2206 = vmatprep.mubr.msk.bf16.mxu0 %vm2436_vm2, %v2435_v43 }
  0xbd   : > { %2267 = vmatprep.subr.bf16.mxu0 %v2437_v45 }
  0xc3   : > { %2207 = vmatmul.mubr.msk.bf16.vlgmr.msra.gmra.mrb[4].mxu0 %vm694_vm0, %v2342_v48 }
  0xc4   : > { %2269 = vmatpush3.bf16.msra.mxu0 %v2268_v49  ;;  %2220 = vmatprep.mubr.msk.f32.mxu0 %vm2436_vm2, %v2435_v43 }
  0xcb   : > { %2221 = vmatmul.mubr.msk.f32.vlgmr.msra.gmra.mrb[8].mxu0 %vm1059_vm3, %v1052_v50 }
 0x18e   : > { %v2194_v54 = vpop.f32.mrb[0].mxu0 }
 0x18f   : > { %v2668_v55 = vadd.f32 %v2194_v54, %v684_v53  ;;  %v739_v56 = vpop.f32.mrb[1].mxu0 }
 0x190   : > { %v2670_v58 = vadd.f32 %v739_v56, %v674_v52  ;;  %v2195_v59 = vpop.f32.mrb[2].mxu0 }
 0x191   : > { %v758_v60 = vand.u32 2147483647, %v2668_v55  ;;  %v742_v61 = vpop.f32.mrb[3].mxu0  ;;  %v755_v39 = vmax.f32 %v2668_v55, 0.0 }
 0x192   : > { %v756_v62 = vand.u32 2147483647, %v2670_v58  ;;  %v2674_v63 = vadd.f32 %v742_v61, %v679_v57  ;;  %v753_v40 = vmax.f32 %v2670_v58, 0.0 }
 0x193   : > { %v761_v0 = vsub.f32 0.0, %v758_v60 }
 0x194   : > { %v759_v1 = vsub.f32 0.0, %v756_v62  ;;  %v757_v2 = vand.u32 2147483647, %v2674_v63  ;;  %v754_v48 = vmax.f32 %v2674_v63, 0.0 }
 0x195   : > { %v766_v3 = vmul.f32 1.442695, %v761_v0 }
 0x196   : > { %v762_v5 = vmul.f32 1.442695, %v759_v1  ;;  %v760_v6 = vsub.f32 0.0, %v757_v2  ;;  %v950_v7 = vpop.f32.mrb[4].mxu0 }
 0x197   : > { %2350 = vpow2.f32 %v766_v3  ;;  %v2677_v8 = vadd.f32 %v950_v7, %v898_v4  ;;  %v2208_v9 = vpop.f32.mrb[5].mxu0  ;;  %v2344_v4 = vld [vmem:[%s2930_s9 + $0x8] sm:$0xff]   ;;  %v2345_v7 = vld [vmem:[%s2934_s13] sm:$0xff]  }
 0x198   : > { %2352 = vpow2.f32 %v762_v5  ;;  %v764_v11 = vmul.f32 1.442695, %v760_v6  ;;  %v953_v12 = vpop.f32.mrb[6].mxu0 }
 0x199   : > { %v959_v13 = vand.u32 2147483647, %v2677_v8  ;;  %v954_v14 = vadd.f32 %v953_v12, %v903_v10  ;;  %v2209_v15 = vpop.f32.mrb[7].mxu0  ;;  %v957_v57 = vmax.f32 %v2677_v8, 0.0  ;;  %v796_v8 = vpop.permute.xlu0 %795  ;;  %v883_v12 = vld [vmem:[%s2926_s5] sm:$0xff] }
 0x19a   : > { %2354 = vpow2.f32 %v764_v11  ;;  %v801_v10 = vpop.permute.xlu1 %800 }
 0x19b   : > { %v961_v16 = vsub.f32 0.0, %v959_v13  ;;  %v960_v17 = vand.u32 2147483647, %v954_v14  ;;  %v958_v62 = vmax.f32 %v954_v14, 0.0 }
 0x19d   : > { %v963_v18 = vmul.f32 1.442695, %v961_v16  ;;  %v962_v19 = vsub.f32 0.0, %v960_v17 }
 0x19e   : > { %v1129_v21 = vpop.f32.mrb[8].mxu0 }
 0x19f   : > { %2356 = vpow2.f32 %v963_v18  ;;  %v965_v22 = vmul.f32 1.442695, %v962_v19  ;;  %v2680_v23 = vadd.f32 %v1129_v21, %v1057_v20  ;;  %v2222_v24 = vpop.f32.mrb[9].mxu0 }
 0x1a1   : > { %v2351_v25 = vpop.eup %2350  ;;  %2358 = vpow2.f32 %v965_v22  ;;  %1182 = vrot.lane.b32.xlu1 %v2680_v23, %s2438_s24  ;;  %1159 = vrot.lane.b32.xlu0 %v2680_v23, %s2439_s8  ;;  %v884_v22 = vld [vmem:[%s2926_s5 + $0x8] sm:$0xff] }
 0x1a2   : > { %v2353_v26 = vpop.eup %2352  ;;  %v770_v27 = vadd.f32 1.0, %v2351_v25 }
 0x1a3   : > { %v768_v29 = vadd.f32 1.0, %v2353_v26 }
 0x1a4   : > { %v2355_v30 = vpop.eup %2354  ;;  %2360 = vlog2.f32 %v770_v27 }
 0x1a5   : > { %2362 = vlog2.f32 %v768_v29  ;;  %v769_v31 = vadd.f32 1.0, %v2355_v30  ;;  %984 = vperm.xlu0 %2338, %v980_v28  }
 0x1a7   : > { %2364 = vlog2.f32 %v769_v31 }
 0x1a9   : > { %v2357_v32 = vpop.eup %2356 }
 0x1aa   : > { %v967_v33 = vadd.f32 1.0, %v2357_v32 }
 0x1ab   : > { %v2359_v34 = vpop.eup %2358 }
 0x1ac   : > { %2366 = vlog2.f32 %v967_v33  ;;  %v968_v35 = vadd.f32 1.0, %v2359_v34  ;;  %v1046_v33 = vld [vmem:[%s2927_s6] sm:$0xff] }
 0x1ae   : > { %v2361_v36 = vpop.eup %2360  ;;  %2368 = vlog2.f32 %v968_v35 }
 0x1af   : > { %v2363_v37 = vpop.eup %2362  ;;  %v776_v38 = vmul.f32 0.6931472, %v2361_v36  ;;  %v1235_v36 = vld [vmem:[%s2938_s17] sm:$0xff] }
 0x1b0   : > { %v772_v41 = vmul.f32 0.6931472, %v2363_v37  ;;  %2225 = vmatprep.mubr.msk.f32.mxu0 %vm1213_vm8, %v1235_v36 }
 0x1b1   : > { %v2365_v42 = vpop.eup %2364  ;;  %v779_v44 = vadd.f32 %v776_v38, %v755_v39 }
 0x1b2   : > { %v774_v49 = vmul.f32 0.6931472, %v2365_v42  ;;  %v777_v50 = vadd.f32 %v772_v41, %v753_v40 }
 0x1b3   : > { %v2111_v53 = vadd.f32 -0.6931472, %v779_v44 }
 0x1b4   : > { %v778_v51 = vadd.f32 %v774_v49, %v754_v48  ;;  %v2109_v54 = vadd.f32 -0.6931472, %v777_v50 }
 0x1b5   : > { %v788_v0 = vpack.c.bf16 %v2111_v53, %v2111_v53 }
 0x1b6   : > { %v2367_v52 = vpop.eup %2366  ;;  %v2110_v56 = vadd.f32 -0.6931472, %v778_v51 }
 0x1b7   : > { %v970_v59 = vmul.f32 0.6931472, %v2367_v52  ;;  %v832_v3 = vsel %vm830_vm5, %v788_v0, 0 }
 0x1b8   : > { %v2369_v60 = vpop.eup %2368  ;;  %v787_v61 = vpack.c.bf16 %v2110_v56, %v2109_v54 }
 0x1b9   : > { %v973_v55 = vadd.f32 %v970_v59, %v957_v57  ;;  %v972_v58 = vmul.f32 0.6931472, %v2369_v60 }
 0x1ba   : > { %2196 = vmatprep.subr.bf16.mxu1 %v787_v61 }
 0x1bb   : > { %v974_v1 = vadd.f32 %v972_v58, %v958_v62  ;;  %2197 = vmatpush3.bf16.msra.mxu1 %v787_v61  ;;  %v2118_v63 = vadd.f32 -0.6931472, %v973_v55  ;;  %v2134_v55 = vld [vmem:[%s2937_s16 + $0x8] sm:$0xff]  ;;  %v792_v62 = vld [vmem:[%s2931_s10 + $0x18] sm:$0xff] }
 0x1bc   : > { %2289 = vmatprep.subr.msk.bf16.mxu1 %vm830_vm5, %v788_v0 }
 0x1bd   : > { %v2119_v2 = vadd.f32 -0.6931472, %v974_v1 }
 0x1bf   : > { %2199 = vmatpush3.bf16.msra.mxu1 %v832_v3  ;;  %v979_v5 = vpack.c.bf16 %v2119_v2, %v2118_v63 }
 0x1c0   : > { %2210 = vmatprep.subr.bf16.mxu1 %v2435_v43 }
 0x1c1   : > { %v1003_v6 = vsel %vm1001_vm6, %v979_v5, 0 }
 0x1c2   : > { %2201 = vmatmul.mubr.msk.bf16.vlgmr.msra.gmra.mrb[0].mxu1 %vm823_vm4, %v2344_v4 }
 0x1c3   : > { %2211 = vmatpush3.bf16.msra.mxu1 %v1003_v6  ;;  %2212 = vmatprep.mubr.msk.bf16.mxu1 %vm2436_vm2, %v2435_v43  ;;  %v1236_v6 = vld [vmem:[%s2938_s17 + $0x8] sm:$0xff] }
 0x1c4   : > { %2270 = vmatprep.subr.bf16.mxu1 %v2437_v45 }
 0x1ca   : > { %2213 = vmatmul.mubr.msk.bf16.vlgmr.msra.gmra.mrb[4].mxu1 %vm997_vm7, %v2345_v7  ;;  %v2125_v7 = vld [vmem:[%s2938_s17 + $0x10] sm:$0xff] }
 0x1cb   : > { %2242 = vmatprep.mubr.msk.f32.mxu1 %vm2436_vm2, %v2435_v43 }
 0x213   : > { %v1183_v17 = vpop.permute.xlu1 %1182  ;;  %v1160_v18 = vpop.permute.xlu0 %1159 }
 0x224   : > { %v985_v31 = vpop.permute.xlu0 %984 }
 0x295   : > { %v2706_v9 = vpop.f32.mrb[0].mxu1 }
 0x296   : > { %v868_v11 = vpop.f32.mrb[1].mxu1 }
 0x297   : > { %v869_v13 = vadd.f32 %v868_v11, %v796_v8  ;;  %v2711_v14 = vpop.f32.mrb[2].mxu1 }
 0x298   : > { %v871_v15 = vpop.f32.mrb[3].mxu1 }
 0x299   : > { %v887_v16 = vmul.f32 %v883_v12, %v869_v13  ;;  %v872_v19 = vadd.f32 %v871_v15, %v801_v10 }
 0x29b   : > { %v1185_v20 = vmul.f32 %v1183_v17, %v887_v16  ;;  %v1162_v21 = vmul.f32 %v1160_v18, %v887_v16  ;;  %v888_v26 = vmul.f32 %v884_v22, %v872_v19  ;;  %v1133_v35 = vmul.f32 %v2680_v23, %v887_v16  ;;  %v2129_v19 = vld [vmem:[%s2938_s17 + $0x20] sm:$0xff] }
 0x29d   : > { %v1039_v24 = vpop.f32.mrb[4].mxu1  ;;  %1188 = vrot.lane.b32.xlu0 %v1185_v20, %s2440_s23  ;;  %1165 = vrot.lane.b32.xlu1 %v1162_v21, %s2440_s23  ;;  %v1186_v29 = vmul.f32 %v1183_v17, %v888_v26  ;;  %v1163_v30 = vmul.f32 %v1160_v18, %v888_v26  ;;  %v1134_v51 = vmul.f32 %v2680_v23, %v888_v26  ;;  %v791_v23 = vld [vmem:[%s2931_s10 + $0x10] sm:$0xff]  ;;  %v2126_v18 = vld [vmem:[%s2938_s17 + $0x18] sm:$0xff] }
 0x29e   : > { %v2214_v25 = vpop.f32.mrb[5].mxu1  ;;  %v1040_v32 = vadd.f32 %v1039_v24, %v985_v31  ;;  %v2133_v31 = vld [vmem:[%s2936_s15 + $0x8] sm:$0xff] }
 0x29f   : > { %v2718_v27 = vpop.f32.mrb[6].mxu1  ;;  %v2130_v25 = vld [vmem:[%s2938_s17 + $0x28] sm:$0xff] }
 0x2a0   : > { %v2215_v28 = vpop.f32.mrb[7].mxu1  ;;  %v1048_v34 = vmul.f32 %v1046_v33, %v1040_v32  ;;  %v885_v33 = vld [vmem:[%s2926_s5 + $0x10] sm:$0xff] }
 0x2a1   : > { %1197 = vrot.lane.b32.xlu0 %v1185_v20, %s2441_s12  ;;  %1174 = vrot.lane.b32.xlu1 %v1162_v21, %s2441_s12 }
 0x2a5   : > { %1193 = vrot.lane.b32.xlu0 %v1186_v29, %s2440_s23  ;;  %1170 = vrot.lane.b32.xlu1 %v1163_v30, %s2440_s23 }
 0x2a9   : > { %1201 = vrot.lane.b32.xlu0 %v1186_v29, %s2441_s12  ;;  %1178 = vrot.lane.b32.xlu1 %v1163_v30, %s2441_s12 }
 0x2ad   : > { %1154 = vrot.lane.b32.xlu1 %v1048_v34, %s2440_s23  ;;  %1136 = vrot.lane.b32.xlu0 %v1133_v35, %s2440_s23 }
 0x2b1   : > { %1145 = vrot.lane.b32.xlu1 %v1133_v35, %s2441_s12 }
 0x30f   : > { %v1189_v37 = vpop.permute.xlu0 %1188  ;;  %v1166_v38 = vpop.permute.xlu1 %1165 }
 0x310   : > { %v1191_v39 = vadd.f32 %v1189_v37, %v1185_v20  ;;  %v1168_v40 = vadd.f32 %v1166_v38, %v1162_v21 }
 0x313   : > { %v1198_v41 = vpop.permute.xlu0 %1197  ;;  %v1175_v42 = vpop.permute.xlu1 %1174 }
 0x314   : > { %v1200_v44 = vadd.f32 %v1198_v41, %v1191_v39  ;;  %v1177_v48 = vadd.f32 %v1175_v42, %v1168_v40  ;;  %v981_v40 = vld [vmem:[%s2935_s14 + $0x8] sm:$0xff] }
 0x316   : > { %1210 = vrot.lane.b32.xlu1 %v1200_v44, %s2442_s22  ;;  %1206 = vrot.lane.b32.xlu0 %v1177_v48, %s2441_s12 }
 0x317   : > { %v1194_v49 = vpop.permute.xlu0 %1193  ;;  %v1171_v50 = vpop.permute.xlu1 %1170 }
 0x318   : > { %v1196_v52 = vadd.f32 %v1194_v49, %v1186_v29  ;;  %v1173_v53 = vadd.f32 %v1171_v50, %v1163_v30  ;;  %v886_v50 = vld [vmem:[%s2926_s5 + $0x18] sm:$0xff] }
 0x31a   : > { %1149 = vrot.lane.b32.xlu1 %v1134_v51, %s2441_s12  ;;  %1141 = vrot.lane.b32.xlu0 %v1134_v51, %s2440_s23 }
 0x31b   : > { %v1202_v54 = vpop.permute.xlu0 %1201  ;;  %v1179_v56 = vpop.permute.xlu1 %1178 }
 0x31c   : > { %v1204_v57 = vadd.f32 %v1202_v54, %v1196_v52  ;;  %v1181_v59 = vadd.f32 %v1179_v56, %v1173_v53 }
 0x31e   : > { %1221 = vrot.lane.b32.xlu1 %v1204_v57, %s2442_s22  ;;  %1217 = vrot.lane.b32.xlu0 %v1181_v59, %s2441_s12  ;;  %v2136_v59 = vld [vmem:[%s2938_s17 + $0x30] sm:$0xff] }
 0x31f   : > { %v1155_v60 = vpop.permute.xlu1 %1154  ;;  %v1137_v58 = vpop.permute.xlu0 %1136 }
 0x320   : > { %v1157_v61 = vadd.f32 %v1155_v60, %v1048_v34  ;;  %v1139_v1 = vadd.f32 %v1137_v58, %v1133_v35 }
 0x322   : > { %1230 = vrot.lane.b32.xlu1 %v1157_v61, %s2441_s12  ;;  %1227 = vrot.lane.b32.xlu0 %v1157_v61, %s2440_s23 }
 0x323   : > { %v1146_v0 = vpop.permute.xlu1 %1145 }
 0x324   : > { %v1148_v63 = vadd.f32 %v1146_v0, %v1139_v1 }
 0x326   : > { %805 = vperm.xlu1 %2339, %v791_v23   ;;  %1498 = vperm.xlu0 %2338, %v2134_v55  }
 0x32a   : > { %810 = vperm.xlu0 %2338, %v792_v62  }
 0x388   : > { %v1211_v2 = vpop.permute.xlu1 %1210  ;;  %v1207_v3 = vpop.permute.xlu0 %1206 }
 0x389   : > { %v1214_v4 = vsel %vm1213_vm8, %v1148_v63, %v1207_v3 }
 0x38a   : > { %v1215_v5 = vsel %vm1059_vm3, %v1214_v4, %v1211_v2 }
 0x38b   : > { %2223 = vmatprep.subr.mxu0 %v1215_v5 }
 0x38c   : > { %v1150_v8 = vpop.permute.xlu1 %1149  ;;  %2224 = vmatpush3.msra.mxu0 %v1215_v5  ;;  %v1142_v10 = vpop.permute.xlu0 %1141 }
 0x38d   : > { %v1144_v11 = vadd.f32 %v1142_v10, %v1134_v51  ;;  %2226 = vmatmul.mubr.msk.f32.vlgmr.msra.gmra.mrb[10].mxu0 %vm1213_vm8, %v1236_v6 }
 0x38e   : > { %2230 = vmatprep.mubr.msk.f32.mxu0 %vm1213_vm8, %v2125_v7 }
 0x38f   : > { %v1152_v12 = vadd.f32 %v1150_v8, %v1144_v11 }
 0x390   : > { %v1222_v13 = vpop.permute.xlu1 %1221  ;;  %v1218_v15 = vpop.permute.xlu0 %1217 }
 0x391   : > { %v1224_v16 = vsel %vm1213_vm8, %v1152_v12, %v1218_v15 }
 0x392   : > { %v1225_v17 = vsel %vm1059_vm3, %v1224_v16, %v1222_v13 }
 0x393   : > { %2228 = vmatprep.subr.mxu0 %v1225_v17 }
 0x394   : > { %v1231_v20 = vpop.permute.xlu1 %1230  ;;  %2229 = vmatpush3.msra.mxu0 %v1225_v17  ;;  %v1228_v21 = vpop.permute.xlu0 %1227 }
 0x395   : > { %v1233_v22 = vsel %vm1213_vm8, %v1157_v61, %v1228_v21  ;;  %2231 = vmatmul.mubr.msk.f32.vlgmr.msra.gmra.mrb[10].mxu0 %vm1213_vm8, %v2126_v18  ;;  %v2137_v21 = vld [vmem:[%s2938_s17 + $0x38] sm:$0xff] }
 0x396   : > { %v1234_v24 = vsel %vm1059_vm3, %v1233_v22, %v1231_v20  ;;  %2235 = vmatprep.mubr.msk.f32.mxu0 %vm1213_vm8, %v2129_v19  ;;  %v2140_v22 = vld [vmem:[%s2938_s17 + $0x40] sm:$0xff] }
 0x397   : > { %2233 = vmatprep.subr.mxu0 %v1234_v24 }
 0x398   : > { %2234 = vmatpush3.msra.mxu0 %v1234_v24 }
 0x399   : > { %2273 = vmatprep.subr.bf16.mxu0 %v2437_v45 }
 0x39d   : > { %2236 = vmatmul.mubr.msk.f32.vlgmr.msra.gmra.mrb[10].mxu0 %vm1213_vm8, %v2130_v25 }
 0x39e   : > { %2264 = vmatprep.mubr.msk.f32.mxu0 %vm2436_vm2, %v2435_v43 }
 0x3a5   : > { %v806_v32 = vpop.permute.xlu1 %805  ;;  %v1499_v34 = vpop.permute.xlu0 %1498 }
 0x3a6   : > { %v877_v43 = vadd.f32 %v2706_v9, %v806_v32 }
 0x3a8   : > { %v889_v36 = vmul.f32 %v885_v33, %v877_v43  ;;  %v2141_v33 = vld [vmem:[%s2938_s17 + $0x48] sm:$0xff] }
 0x3a9   : > { %v811_v9 = vpop.permute.xlu0 %810 }
 0x3aa   : > { %v880_v49 = vadd.f32 %v2711_v14, %v811_v9  ;;  %v1047_v14 = vld [vmem:[%s2927_s6 + $0x8] sm:$0xff]  ;;  %v1318_v9 = vadd.f32 nan, %v2645_v46 }
 0x3ac   : > { %v890_v51 = vmul.f32 %v886_v50, %v880_v49 }
 0x470   : > { %v2784_v26 = vpop.f32.mrb[10].mxu0 }
 0x471   : > { %v2276_v28 = vadd.f32 %v2784_v26, %v2650_v47  ;;  %v2788_v29 = vpop.f32.mrb[11].mxu0 }
 0x472   : > { %v2277_v30 = vadd.f32 %v2788_v29, %v2645_v46 }
 0x474   : > { %v2271_v45 = vpack.c.bf16 %v2276_v28, %v2277_v30 }
 0x476   : > { %2272 = vmatpush3.bf16.msra.mxu1 %v2271_v45 }
 0x479   : > { %2243 = vmatmul.mubr.msk.f32.vlgmr.msra.gmra.mrb[8].mxu1 %vm1059_vm3, %v2133_v31 }
 0x47a   : > { %2247 = vmatprep.mubr.msk.f32.mxu1 %vm1213_vm8, %v2136_v59  ;;  %v1951_v59 = vld [vmem:[%s2939_s18] sm:$0x1] }
 0x54c   : > { %v1570_v35 = vpop.f32.mrb[8].mxu1 }
 0x54d   : > { %v1571_v37 = vadd.f32 %v1570_v35, %v1499_v34  ;;  %v2244_v38 = vpop.f32.mrb[9].mxu1  ;;  %v2144_v34 = vld [vmem:[%s2938_s17 + $0x50] sm:$0xff] }
 0x54f   : > { %1623 = vrot.lane.b32.xlu0 %v1571_v37, %s2438_s24  ;;  %1600 = vrot.lane.b32.xlu1 %v1571_v37, %s2439_s8  ;;  %v1574_v39 = vmul.f32 %v1571_v37, %v889_v36  ;;  %v1575_v2 = vmul.f32 %v1571_v37, %v890_v51 }
 0x553   : > { %989 = vperm.xlu1 %2339, %v981_v40   ;;  %v1319_v40 = vadd.f32 nan, %v2650_v47 }
 0x5c1   : > { %v1601_v41 = vpop.permute.xlu1 %1600  ;;  %v1624_v42 = vpop.permute.xlu0 %1623 }
 0x5c2   : > { %v1603_v44 = vmul.f32 %v1601_v41, %v889_v36  ;;  %v1626_v48 = vmul.f32 %v1624_v42, %v889_v36  ;;  %v1604_v52 = vmul.f32 %v1601_v41, %v890_v51  ;;  %v1627_v53 = vmul.f32 %v1624_v42, %v890_v51 }
 0x5c3   : > { %v1405_v41 = vadd.f32 nan, %v1319_v40  ;;  %v1404_v42 = vadd.f32 nan, %v1318_v9 }
 0x5c4   : > { %1606 = vrot.lane.b32.xlu0 %v1603_v44, %s2440_s23  ;;  %1629 = vrot.lane.b32.xlu1 %v1626_v48, %s2440_s23 }
 0x5c8   : > { %1615 = vrot.lane.b32.xlu0 %v1603_v44, %s2441_s12  ;;  %1638 = vrot.lane.b32.xlu1 %v1626_v48, %s2441_s12 }
 0x5cc   : > { %1611 = vrot.lane.b32.xlu0 %v1604_v52, %s2440_s23  ;;  %1634 = vrot.lane.b32.xlu1 %v1627_v53, %s2440_s23 }
 0x5d0   : > { %1619 = vrot.lane.b32.xlu0 %v1604_v52, %s2441_s12  ;;  %1642 = vrot.lane.b32.xlu1 %v1627_v53, %s2441_s12 }
 0x5d2   : > { %v990_v54 = vpop.permute.xlu1 %989 }
 0x5d3   : > { %v1043_v56 = vadd.f32 %v2718_v27, %v990_v54 }
 0x5d4   : > { %1577 = vrot.lane.b32.xlu1 %v1574_v39, %s2440_s23 }
 0x5d5   : > { %v1049_v57 = vmul.f32 %v1047_v14, %v1043_v56 }
 0x5d7   : > { %1595 = vrot.lane.b32.xlu0 %v1049_v57, %s2440_s23 }
 0x5db   : > { %1586 = vrot.lane.b32.xlu0 %v1574_v39, %s2441_s12 }
 0x636   : > { %v1630_v60 = vpop.permute.xlu1 %1629  ;;  %v1607_v61 = vpop.permute.xlu0 %1606 }
 0x637   : > { %v1632_v23 = vadd.f32 %v1630_v60, %v1626_v48  ;;  %v1609_v55 = vadd.f32 %v1607_v61, %v1603_v44  ;;  %v1491_v44 = vadd.f32 %v2784_v26, %v1405_v41  ;;  %v1490_v48 = vadd.f32 %v2788_v29, %v1404_v42 }
 0x63a   : > { %v1639_v62 = vpop.permute.xlu1 %1638  ;;  %v1616_v58 = vpop.permute.xlu0 %1615 }
 0x63b   : > { %v1641_v27 = vadd.f32 %v1639_v62, %v1632_v23  ;;  %v1618_v0 = vadd.f32 %v1616_v58, %v1609_v55 }
 0x63d   : > { %1651 = vrot.lane.b32.xlu0 %v1641_v27, %s2442_s22  ;;  %1647 = vrot.lane.b32.xlu1 %v1618_v0, %s2441_s12 }
 0x63e   : > { %v1635_v1 = vpop.permute.xlu1 %1634  ;;  %v1612_v63 = vpop.permute.xlu0 %1611 }
 0x63f   : > { %v1637_v3 = vadd.f32 %v1635_v1, %v1627_v53  ;;  %v1614_v4 = vadd.f32 %v1612_v63, %v1604_v52 }
 0x641   : > { %1590 = vrot.lane.b32.xlu0 %v1575_v2, %s2441_s12  ;;  %1582 = vrot.lane.b32.xlu1 %v1575_v2, %s2440_s23 }
 0x642   : > { %v1643_v5 = vpop.permute.xlu1 %1642  ;;  %v1620_v6 = vpop.permute.xlu0 %1619 }
 0x643   : > { %v1645_v7 = vadd.f32 %v1643_v5, %v1637_v3  ;;  %v1622_v8 = vadd.f32 %v1620_v6, %v1614_v4 }
 0x645   : > { %1661 = vrot.lane.b32.xlu0 %v1645_v7, %s2442_s22  ;;  %1657 = vrot.lane.b32.xlu1 %v1622_v8, %s2441_s12  ;;  %s2149_s22 = sshll.u32 %s2565_s1, 4  ;;  %s2443_s1 = smov [#allocation2]  }
 0x646   : > { %v1578_v12 = vpop.permute.xlu1 %1577  ;;  %s2879_s24 = scalar_lea.hbm %s2940_s19, %s2149_s22  ;;  %s2374_s29 = sshll.u32 %s2443_s1, 4  ;;  %s2375_s29 = int_to_ptr.vmem [resolvable:$false] %s2374_s29 }
 0x647   : > { %v1580_v15 = vadd.f32 %v1578_v12, %v1574_v39  ;;  %v2145_v39 = vld [vmem:[%s2938_s17 + $0x58] sm:$0xff]  ;;  %s2376_s20 = scalar_lea.vmem %s2375_s29, 32 }
 0x649   : > { %v1596_v10 = vpop.permute.xlu0 %1595 }
 0x64a   : > { %v1598_v11 = vadd.f32 %v1596_v10, %v1049_v57 }
 0x64c   : > { %1670 = vrot.lane.b32.xlu0 %v1598_v11, %s2441_s12  ;;  %1667 = vrot.lane.b32.xlu1 %v1598_v11, %s2440_s23 }
 0x64d   : > { %v1587_v13 = vpop.permute.xlu0 %1586 }
 0x64e   : > { %v1589_v16 = vadd.f32 %v1587_v13, %v1580_v15 }
 0x6af   : > { %v1648_v17 = vpop.permute.xlu1 %1647  ;;  %v1652_v18 = vpop.permute.xlu0 %1651 }
 0x6b0   : > { %v1654_v19 = vsel %vm1213_vm8, %v1589_v16, %v1648_v17 }
 0x6b1   : > { %v1655_v20 = vsel %vm1059_vm3, %v1654_v19, %v1652_v18 }
 0x6b2   : > { %2245 = vmatprep.subr.mxu1 %v1655_v20 }
 0x6b3   : > { %v1583_v24 = vpop.permute.xlu1 %1582  ;;  %2246 = vmatpush3.msra.mxu1 %v1655_v20  ;;  %v1591_v25 = vpop.permute.xlu0 %1590 }
 0x6b4   : > { %v1585_v28 = vadd.f32 %v1583_v24, %v1575_v2  ;;  %2248 = vmatmul.mubr.msk.f32.vlgmr.msra.gmra.mrb[10].mxu1 %vm1213_vm8, %v2137_v21 }
 0x6b5   : > { %2252 = vmatprep.mubr.msk.f32.mxu1 %vm1213_vm8, %v2140_v22 }
 0x6b6   : > { %v1593_v30 = vadd.f32 %v1591_v25, %v1585_v28 }
 0x6b7   : > { %v1658_v45 = vpop.permute.xlu1 %1657  ;;  %v1662_v31 = vpop.permute.xlu0 %1661 }
 0x6b8   : > { %v1664_v32 = vsel %vm1213_vm8, %v1593_v30, %v1658_v45 }
 0x6b9   : > { %v1665_v43 = vsel %vm1059_vm3, %v1664_v32, %v1662_v31 }
 0x6ba   : > { %2250 = vmatprep.subr.mxu1 %v1665_v43 }
 0x6bb   : > { %2251 = vmatpush3.msra.mxu1 %v1665_v43 }
 0x6bc   : > { %2253 = vmatmul.mubr.msk.f32.vlgmr.msra.gmra.mrb[10].mxu1 %vm1213_vm8, %v2141_v33 }
 0x6bd   : > { %2257 = vmatprep.mubr.msk.f32.mxu1 %vm1213_vm8, %v2144_v34 }
 0x6be   : > { %v1668_v35 = vpop.permute.xlu1 %1667  ;;  %v1671_v36 = vpop.permute.xlu0 %1670 }
 0x6bf   : > { %v1673_v37 = vsel %vm1213_vm8, %v1598_v11, %v1668_v35 }
 0x6c0   : > { %v1674_v38 = vsel %vm1059_vm3, %v1673_v37, %v1671_v36 }
 0x6c1   : > { %2255 = vmatprep.subr.mxu1 %v1674_v38 }
 0x6c2   : > { %2256 = vmatpush3.msra.mxu1 %v1674_v38 }
 0x6c4   : > { %2258 = vmatmul.mubr.msk.f32.vlgmr.msra.gmra.mrb[10].mxu1 %vm1213_vm8, %v2145_v39 }
 0x797   : > { %v2259_v49 = vpop.f32.mrb[10].mxu1 }
 0x798   : > { %v2278_v50 = vadd.f32 %v2259_v49, %v1491_v44  ;;  %v1922_v51 = vpop.f32.mrb[11].mxu1 }
 0x799   : > { %v2279_v52 = vadd.f32 %v1922_v51, %v1490_v48 }
 0x79a   : > { %1937 = vrot.lane.b32.xlu0 %v2278_v50, %s2440_s23 }
 0x79b   : > { %1935 = vrot.lane.b32.xlu1 %v2279_v52, %s2440_s23  ;;  %s600_s23 = sand.u32 1, %s2424_s30  }
 0x79c   : > { %s2028_s28 = scalar_lea.sflag [#allocation3], %s600_s23 }
 0x79e   : > { %1945 = vrot.lane.b32.xlu0 %v2278_v50, %s2441_s12 }
 0x79f   : > { %1943 = vrot.lane.b32.xlu1 %v2279_v52, %s2441_s12  ;;  %s601_s12 = scalar_lea.vmem [#allocation2], %s600_s23 }
 0x7a0   : > { %s2040_s26 = sshll.u32 %s601_s12, 4  ;;  %s2881_s26 = int_to_ptr.vmem [resolvable:$true] %s2040_s26 }
 0x7a1   : > { %s2370_s8 = scalar_lea.vmem %s2881_s26, 16  ;;  %p2377_p0 = scmp.lt.s32.totalorder %s2881_s26, %s2375_s29 }
 0x7a2   : > { %p2371_p11 = scmp.ne.s32.totalorder %s2881_s26, %s2370_s8  ;;  %p2378_p1 = scmp.lt.s32.totalorder %s2376_s20, %s2370_s8 }
 0x7a4   : > { %p2372_p12 = pnand %p2371_p11, %p2582_p5  ;;  %p2379_p2 = por %p2378_p1, %p2377_p0 }
 0x7a6   : > { %p2373_p13 = pneg %p2372_p12 }
 0x7a8   : > { %p2380_p3 = pnand %p2379_p2, %p2373_p13 }
 0x80c   : > { %v1938_v46 = vpop.permute.xlu0 %1937 }
 0x80d   : > { %v1936_v47 = vpop.permute.xlu1 %1935  ;;  %v1942_v53 = vadd.f32 %v2278_v50, %v1938_v46 }
 0x80e   : > { %v1941_v26 = vadd.f32 %v2279_v52, %v1936_v47 }
 0x810   : > { %v1946_v14 = vpop.permute.xlu0 %1945 }
 0x811   : > { %v1950_v29 = vadd.f32 %v1946_v14, %v1942_v53  ;;  %v1944_v54 = vpop.permute.xlu1 %1943 }
 0x812   : > { %v1949_v56 = vadd.f32 %v1944_v54, %v1941_v26 }
 0x814   : > { %v2274_v57 = vpack.c.bf16 %v1950_v29, %v1949_v56 }
 0x816   : > { %2275 = vmatpush3.bf16.msra.mxu0 %v2274_v57 }
 0x819   : > { %2265 = vmatmul.mubr.msk.f32.vlgmr.msra.gmra.mrb[12].mxu0 %vm1059_vm3, %v1951_v59 }
 0x8ec   : > { %v2021_v60 = vpop.f32.mrb[12].mxu0 }
 0x8ed   : > { %2026 = vst.msk [vmem:[%s601_s12] sm:$0x1] %vm2025_vm9, %v2021_v60  ;;  %v2266_v61 = vpop.f32.mrb[13].mxu0 }
 0x8ee   : > { %2383 = shalt.err (!%p2380_p3)
}
 0x8ef   : > { %s2384_s25 = scalar_lea.hbm %s2879_s24, 16  ;;  %s2388_s22 = scalar_lea.hbm %s2940_s19, 32 }
 0x8f0   : > { %p2385_p4 = scmp.ne.s32.totalorder %s2879_s24, %s2384_s25  ;;  %p2389_p9 = scmp.lt.u32.totalorder %s2879_s24, %s2940_s19 }
 0x8f1   : > { %p2390_p10 = scmp.lt.u32.totalorder %s2388_s22, %s2384_s25  ;;  %p2392_p12 = scmp.lt.u32.totalorder %s2384_s25, %s2879_s24 }
 0x8f2   : > { %p2386_p7 = pnand %p2385_p4, %p2582_p5 }
 0x8f3   : > { %p2391_p11 = por %p2390_p10, %p2389_p9 }
 0x8f4   : > { %p2387_p8 = pneg %p2386_p7 }
 0x8f5   : > { %p2393_p13 = por %p2392_p12, %p2391_p11 }
 0x8f7   : > { %p2394_p0 = pnand %p2393_p13, %p2387_p8 }
 0x8f9   : > { %2397 = shalt.err (!%p2394_p0)
}
 0x8fa   : > { %2290 = dma.vmem_to_hbm [thread:$0]  (%p2582_p5), %s2881_s26, 16, %s2879_s24, %s2028_s28  }
 0x8fb PF: > { %s2965_s27 = sld [smem:[#allocation5_spill]]  ;;  %p2296_p1 = scmp.ge.s32.totalorder %s2432_s21, 2 }
 0x8fd   : > { %p2293_p2 = pnand %p2296_p1, %p2586_p6 }
 0x901   : > { %s2052_s1 = sand.u32 1, %s2965_s27  }
 0x902   : > { %s2053_s29 = scalar_lea.sflag [#allocation3], %s2052_s1 }
 0x903   : > { %2415 = dma.done.wait (!%p2293_p2), %s2053_s29, 16  }
 0x904   : > { %2417 = vsyncadd (!%p2293_p2), %s2053_s29, 4294967280  ;;  %s2967_s21 = sld [smem:[#allocation7_spill]]  ;;  %s2968_s20 = sld [smem:[#allocation6_spill]] }
 0x905   : > { %s2969_s25 = sld [smem:[#allocation8_spill]]  ;;  %s2970_s0 = smov %s2424_s30 }
 0x90a   : > { %p29_p3 = scmp.ge.s32.totalorder %s2967_s21, 4   ;;  %s2971_s30 = smov %s2968_s20 }
 0x90b   : > { %s2972_s20 = smov %s2969_s25 }
 0x90c   :  { %31 = sbr.rel (!%p29_p3) target bundleno = 10 (0xa), region = 141 }
 0x913   :  { %2057 = vsyncpa [#allocation3], 1 }
 0x914   :  { %2059 = vsyncpa [#allocation3 + $0x1], 1 }

</bundles_post_ra>
